<compile_context>
chip_gen: v6e
topology: v6e:2x2x1
jax: 0.10.0
libtpu: 0.0.40
codegen_flags: <defaults>
</compile_context>

<pallas_src>
import math

import jax
import jax.numpy as jnp
from jax import lax
from jax.experimental import pallas as pl
from jax.experimental.pallas import tpu as pltpu

_INV_SQRT2 = 1.0 / math.sqrt(2.0)
_EPS = 1e-5  # InstanceNorm3d default eps


def _cparams():
    # Batch axis is independent -> "parallel" (sharded across TCs on v7x,
    # harmless on v5e/v6e).  Tiny blocks -> default VMEM limits are plenty.
    return pltpu.CompilerParams(dimension_semantics=("parallel",))


# ---------------------------------------------------------------------------
# In-kernel math helpers (only ops with guaranteed Mosaic lowerings)
# ---------------------------------------------------------------------------
def _erf(x):
    # Abramowitz & Stegun 7.1.26 polynomial erf, max abs error ~1.5e-7
    # (far below the bf16 matmul noise floor).  Uses abs/exp/where/div only.
    a1, a2, a3, a4, a5 = (0.254829592, -0.284496736, 1.421413741,
                          -1.453152027, 1.061405429)
    p = 0.3275911
    ax = jnp.abs(x)
    t = 1.0 / (1.0 + p * ax)
    poly = ((((a5 * t + a4) * t + a3) * t + a2) * t + a1) * t
    y = 1.0 - poly * jnp.exp(-(ax * ax))
    return jnp.where(x < 0.0, -y, y)


def _gelu_exact(x):
    # nn.GELU() default: exact erf formulation.
    return 0.5 * x * (1.0 + _erf(x * _INV_SQRT2))


def _instance_norm(acc):
    # acc: (C, M) f32.  One-pass per-channel stats (biased variance, clamped).
    inv_m = 1.0 / acc.shape[1]
    s1 = jnp.sum(acc, axis=1, keepdims=True)
    s2 = jnp.sum(acc * acc, axis=1, keepdims=True)
    mean = s1 * inv_m
    var = jnp.maximum(s2 * inv_m - mean * mean, 0.0)
    return (acc - mean) * lax.rsqrt(var + _EPS)


# ---------------------------------------------------------------------------
# Fused (Cout, K) @ (K, M) matmul + InstanceNorm3d (affine=False) + exact GELU
#   * k=3 convs feed K = 27*Cin im2col patches; lane dim is M = D*H*W.
# ---------------------------------------------------------------------------
def _mm_in_gelu_kernel(x_ref, w_ref, o_ref):
    xb = x_ref[0].astype(jnp.bfloat16)                         # (K, M) bf16
    acc = jnp.dot(w_ref[...], xb, preferred_element_type=jnp.float32)
    o_ref[0] = _gelu_exact(_instance_norm(acc))                # (Cout, M) f32


def matmul_in_gelu(x, w):
    """x: (N, K, M), w: (Cout, K) bf16 -> (N, Cout, M) f32."""
    N, K, M = x.shape
    Cout = w.shape[0]
    return pl.pallas_call(
        _mm_in_gelu_kernel,
        out_shape=jax.ShapeDtypeStruct((N, Cout, M), jnp.float32),
        grid=(N,),
        in_specs=[
            pl.BlockSpec((1, K, M), lambda n: (n, 0, 0)),
            pl.BlockSpec((Cout, K), lambda n: (0, 0)),
        ],
        out_specs=pl.BlockSpec((1, Cout, M), lambda n: (n, 0, 0)),
        compiler_params=_cparams(),
    )(x, w)


# ---------------------------------------------------------------------------
# Fused real_conv: (1x1 conv + IN + GELU) x 2 in a single kernel
# ---------------------------------------------------------------------------
def _double_mm_in_gelu_kernel(x_ref, w1_ref, w2_ref, o_ref):
    xb = x_ref[0].astype(jnp.bfloat16)                         # (C, M)
    h = jnp.dot(w1_ref[...], xb, preferred_element_type=jnp.float32)
    h = _gelu_exact(_instance_norm(h))
    y = jnp.dot(w2_ref[...], h.astype(jnp.bfloat16),
                preferred_element_type=jnp.float32)
    o_ref[0] = _gelu_exact(_instance_norm(y))


def double_pointwise_in_gelu(x, w1, w2):
    """x: (N, C, M) f32, w1/w2: (C, C) bf16 -> (N, C, M) f32."""
    N, C, M = x.shape
    return pl.pallas_call(
        _double_mm_in_gelu_kernel,
        out_shape=jax.ShapeDtypeStruct((N, C, M), jnp.float32),
        grid=(N,),
        in_specs=[
            pl.BlockSpec((1, C, M), lambda n: (n, 0, 0)),
            pl.BlockSpec((C, C), lambda n: (0, 0)),
            pl.BlockSpec((C, C), lambda n: (0, 0)),
        ],
        out_specs=pl.BlockSpec((1, C, M), lambda n: (n, 0, 0)),
        compiler_params=_cparams(),
    )(x, w1, w2)


# ---------------------------------------------------------------------------
# im2col for the k=3, padding=1 convs (wrapper-side, emitted directly in bf16)
# ---------------------------------------------------------------------------
def _im2col_3x3x3(x):
    """x: (N, C, D, H, W) -> bf16 patches (N, 27*C, D*H*W).

    Row index = tap*C + ci with tap = kd*9 + kh*3 + kw (matches init_params).
    """
    N, C, D, H, W = x.shape
    xp = jnp.pad(x.astype(jnp.bfloat16),
                 ((0, 0), (0, 0), (1, 1), (1, 1), (1, 1)))
    cols = []
    for kd in range(3):
        for kh in range(3):
            for kw in range(3):
                cols.append(xp[:, :, kd:kd + D, kh:kh + H, kw:kw + W])
    patches = jnp.stack(cols, axis=1)              # (N, 27, C, D, H, W)
    return patches.reshape(N, 27 * C, D * H * W)


def conv3x3_in_gelu(x, w):
    """Conv3d(k=3, pad=1, no bias) + InstanceNorm3d + GELU.  x: (N,C,D,H,W)."""
    N, C, D, H, W = x.shape
    patches = _im2col_3x3x3(x)                     # (N, 27*C, M) bf16
    out = matmul_in_gelu(patches, w)               # (N, Cout, M) f32
    return out.reshape(N, w.shape[0], D, H, W)


# ---------------------------------------------------------------------------
# Lane-dense residual triple-add (x_skip + x_conv + irfft(...))
# ---------------------------------------------------------------------------
def _add3_kernel(a_ref, b_ref, c_ref, o_ref):
    o_ref[...] = a_ref[...] + b_ref[...] + c_ref[...]


def add3(a, b, c):
    N, C, M = a.shape
    return pl.pallas_call(
        _add3_kernel,
        out_shape=jax.ShapeDtypeStruct((N, C, M), jnp.float32),
        grid=(N,),
        in_specs=[pl.BlockSpec((1, C, M), lambda n: (n, 0, 0))] * 3,
        out_specs=pl.BlockSpec((1, C, M), lambda n: (n, 0, 0)),
        compiler_params=_cparams(),
    )(a, b, c)


# ---------------------------------------------------------------------------
# DownBlock forward (glue in plain JAX, hot paths in Pallas)
# ---------------------------------------------------------------------------
def down_block_forward(x, p):
    """x: (N, Cin, D, H, W) float32.  Returns (down_out, skip_out)."""
    N, _, D, H, W = x.shape
    M = D * H * W

    # DoubleConv
    y = conv3x3_in_gelu(x, p["dc_w1"])
    y = conv3x3_in_gelu(y, p["dc_w2"])

    # ResFBlock
    x_skip = y
    x_conv = conv3x3_in_gelu(y, p["f_dc_w1"])
    x_conv = conv3x3_in_gelu(x_conv, p["f_dc_w2"])

    # TODO(synk): FFTs have no Pallas primitive; computed with jnp.fft (XLA op).
    xr = jnp.abs(jnp.fft.rfftn(y, s=(D, H, W), axes=(2, 3, 4)))
    xr = xr.astype(jnp.float32)                    # (N, C, D, H, W//2+1)
    C, Wr = xr.shape[1], xr.shape[-1]
    xr = double_pointwise_in_gelu(xr.reshape(N, C, D * H * Wr),
                                  p["f_r_w1"], p["f_r_w2"])
    x_ifft = jnp.fft.irfftn(xr.reshape(N, C, D, H, Wr), s=(D, H, W),
                            axes=(2, 3, 4)).astype(jnp.float32)

    # skip_out = x_skip + x_conv + irfft(...)  (lane-dense Pallas add)
    skip_flat = add3(x_skip.reshape(N, C, M), x_conv.reshape(N, C, M),
                     x_ifft.reshape(N, C, M))
    skip_out = skip_flat.reshape(N, C, D, H, W)

    # TODO(synk): MaxPool3d(2) pools the lane (W) dim; Mosaic strided loads need
    # a unit minor-most stride, so the window max stays an XLA reduce_window.
    down_out = lax.reduce_window(skip_out, -jnp.inf, lax.max,
                                 window_dimensions=(1, 1, 2, 2, 2),
                                 window_strides=(1, 1, 2, 2, 2),
                                 padding="VALID")
    return down_out, skip_out


# ---------------------------------------------------------------------------
# Deterministic synthetic parameter initialization
# ---------------------------------------------------------------------------
def init_params(key, in_c, out_c):
    ks = jax.random.split(key, 6)

    def w3(k, cin, cout):
        # PyTorch Conv3d weight (cout, cin, kd, kh, kw) maps to
        #   w[o, tap*cin + ci] = weight[o, ci, kd, kh, kw], tap = kd*9+kh*3+kw
        fan_in = cin * 27
        w = jax.random.normal(k, (cout, 27 * cin), jnp.float32) / math.sqrt(fan_in)
        return w.astype(jnp.bfloat16)

    def w1(k, cin, cout):
        w = jax.random.normal(k, (cout, cin), jnp.float32) / math.sqrt(cin)
        return w.astype(jnp.bfloat16)

    # Conv biases intentionally omitted: every conv feeds
    # InstanceNorm3d(affine=False), whose mean subtraction cancels a
    # per-channel bias exactly.
    return {
        "dc_w1": w3(ks[0], in_c, out_c),
        "dc_w2": w3(ks[1], out_c, out_c),
        "f_dc_w1": w3(ks[2], out_c, out_c),
        "f_dc_w2": w3(ks[3], out_c, out_c),
        "f_r_w1": w1(ks[4], out_c, out_c),
        "f_r_w2": w1(ks[5], out_c, out_c),
    }


if __name__ == "__main__":
    key = jax.random.PRNGKey(0)
    kx, kp = jax.random.split(key)

    in_c, out_c = 4, 8
    N, D, H, W = 2, 8, 8, 8

    x = jax.random.normal(kx, (N, in_c, D, H, W), jnp.float32)
    params = init_params(kp, in_c, out_c)

    fwd = jax.jit(down_block_forward)
    down_out, skip_out = fwd(x, params)
    jax.block_until_ready((down_out, skip_out))

    assert down_out.shape == (N, out_c, D // 2, H // 2, W // 2)
    assert skip_out.shape == (N, out_c, D, H, W)
    assert bool(jnp.all(jnp.isfinite(down_out)))
    assert bool(jnp.all(jnp.isfinite(skip_out)))
    print("KERNEL_OK")
</pallas_src>

<mosaic_0001>
module attributes {stable_mosaic.version = 11 : i64} {
  func.func @_mm_in_gelu_kernel(%arg0: i32, %arg1: memref<1x108x512xbf16, #tpu.memory_space<vmem>>, %arg2: memref<8x108xbf16, #tpu.memory_space<vmem>>, %arg3: memref<1x8x512xf32, #tpu.memory_space<vmem>>) attributes {dimension_semantics = [#tpu.dimension_semantics<parallel>], iteration_bounds = array<i64: 2>, scalar_prefetch = 0 : i64, scratch_operands = 0 : i64, tpu.core_type = #tpu.core_type<tc>, window_params = [{transform_indices = @transform_0, window_bounds = array<i64: 1, 108, 512>}, {pipeline_mode = #tpu.pipeline_mode<synchronous>, transform_indices = @transform_1, window_bounds = array<i64: 8, 108>}, {transform_indices = @transform_2, window_bounds = array<i64: 1, 8, 512>}]} {
    %c0 = arith.constant 0 : index
    %c0_0 = arith.constant 0 : index
    %c0_1 = arith.constant 0 : index
    %0 = vector.load %arg1[%c0, %c0_0, %c0_1] : memref<1x108x512xbf16, #tpu.memory_space<vmem>>, vector<1x108x512xbf16>
    %1 = vector.shape_cast %0 : vector<1x108x512xbf16> to vector<108x512xbf16>
    %c0_2 = arith.constant 0 : index
    %c0_3 = arith.constant 0 : index
    %2 = vector.load %arg2[%c0_2, %c0_3] : memref<8x108xbf16, #tpu.memory_space<vmem>>, vector<8x108xbf16>
    %cst = arith.constant dense<0.000000e+00> : vector<8x512xf32>
    %3 = tpu.matmul %2, %1, %cst {dimension_numbers = #tpu.dot_dimension_numbers<[1], [0], [0], [1], [0, 0, 1, 1], [], []>} : vector<8x108xbf16>, vector<108x512xbf16>, vector<8x512xf32> -> vector<8x512xf32>
    %cst_4 = arith.constant dense<0.000000e+00> : vector<8xf32>
    %4 = vector.multi_reduction <add>, %3, %cst_4 [1] : vector<8x512xf32> to vector<8xf32>
    %5 = vector.shape_cast %4 : vector<8xf32> to vector<8x1xf32>
    %6 = arith.mulf %3, %3 : vector<8x512xf32>
    %cst_5 = arith.constant dense<0.000000e+00> : vector<8xf32>
    %7 = vector.multi_reduction <add>, %6, %cst_5 [1] : vector<8x512xf32> to vector<8xf32>
    %8 = vector.shape_cast %7 : vector<8xf32> to vector<8x1xf32>
    %cst_6 = arith.constant 0.001953125 : f32
    %9 = vector.broadcast %cst_6 : f32 to vector<8x1xf32>
    %10 = arith.mulf %5, %9 : vector<8x1xf32>
    %cst_7 = arith.constant 0.001953125 : f32
    %11 = vector.broadcast %cst_7 : f32 to vector<8x1xf32>
    %12 = arith.mulf %8, %11 : vector<8x1xf32>
    %13 = arith.mulf %10, %10 : vector<8x1xf32>
    %14 = arith.subf %12, %13 : vector<8x1xf32>
    %cst_8 = arith.constant 0.000000e+00 : f32
    %15 = vector.broadcast %cst_8 : f32 to vector<8x1xf32>
    %16 = arith.maximumf %14, %15 : vector<8x1xf32>
    %17 = vector.broadcast %10 : vector<8x1xf32> to vector<8x512xf32>
    %18 = arith.subf %3, %17 : vector<8x512xf32>
    %cst_9 = arith.constant 9.99999974E-6 : f32
    %19 = vector.broadcast %cst_9 : f32 to vector<8x1xf32>
    %20 = arith.addf %16, %19 : vector<8x1xf32>
    %21 = math.rsqrt %20 : vector<8x1xf32>
    %22 = vector.broadcast %21 : vector<8x1xf32> to vector<8x512xf32>
    %23 = arith.mulf %18, %22 : vector<8x512xf32>
    %cst_10 = arith.constant 5.000000e-01 : f32
    %24 = vector.broadcast %cst_10 : f32 to vector<8x512xf32>
    %25 = arith.mulf %24, %23 : vector<8x512xf32>
    %cst_11 = arith.constant 0.707106769 : f32
    %26 = vector.broadcast %cst_11 : f32 to vector<8x512xf32>
    %27 = arith.mulf %23, %26 : vector<8x512xf32>
    %28 = math.absf %27 : vector<8x512xf32>
    %cst_12 = arith.constant 0.327591091 : f32
    %29 = vector.broadcast %cst_12 : f32 to vector<8x512xf32>
    %30 = arith.mulf %29, %28 : vector<8x512xf32>
    %cst_13 = arith.constant 1.000000e+00 : f32
    %31 = vector.broadcast %cst_13 : f32 to vector<8x512xf32>
    %32 = arith.addf %31, %30 : vector<8x512xf32>
    %cst_14 = arith.constant 1.000000e+00 : f32
    %33 = vector.broadcast %cst_14 : f32 to vector<8x512xf32>
    %34 = arith.divf %33, %32 : vector<8x512xf32>
    %cst_15 = arith.constant 1.06140542 : f32
    %35 = vector.broadcast %cst_15 : f32 to vector<8x512xf32>
    %36 = arith.mulf %35, %34 : vector<8x512xf32>
    %cst_16 = arith.constant -1.45315206 : f32
    %37 = vector.broadcast %cst_16 : f32 to vector<8x512xf32>
    %38 = arith.addf %36, %37 : vector<8x512xf32>
    %39 = arith.mulf %38, %34 : vector<8x512xf32>
    %cst_17 = arith.constant 1.42141378 : f32
    %40 = vector.broadcast %cst_17 : f32 to vector<8x512xf32>
    %41 = arith.addf %39, %40 : vector<8x512xf32>
    %42 = arith.mulf %41, %34 : vector<8x512xf32>
    %cst_18 = arith.constant -0.284496725 : f32
    %43 = vector.broadcast %cst_18 : f32 to vector<8x512xf32>
    %44 = arith.addf %42, %43 : vector<8x512xf32>
    %45 = arith.mulf %44, %34 : vector<8x512xf32>
    %cst_19 = arith.constant 0.254829586 : f32
    %46 = vector.broadcast %cst_19 : f32 to vector<8x512xf32>
    %47 = arith.addf %45, %46 : vector<8x512xf32>
    %48 = arith.mulf %47, %34 : vector<8x512xf32>
    %49 = arith.mulf %28, %28 : vector<8x512xf32>
    %cst_20 = arith.constant 0.000000e+00 : f32
    %50 = vector.broadcast %cst_20 : f32 to vector<8x512xf32>
    %51 = arith.subf %50, %49 : vector<8x512xf32>
    %52 = math.exp %51 : vector<8x512xf32>
    %53 = arith.mulf %48, %52 : vector<8x512xf32>
    %cst_21 = arith.constant 1.000000e+00 : f32
    %54 = vector.broadcast %cst_21 : f32 to vector<8x512xf32>
    %55 = arith.subf %54, %53 : vector<8x512xf32>
    %cst_22 = arith.constant 0.000000e+00 : f32
    %56 = vector.broadcast %cst_22 : f32 to vector<8x512xf32>
    %57 = arith.cmpf olt, %27, %56 : vector<8x512xf32>
    %cst_23 = arith.constant 0.000000e+00 : f32
    %58 = vector.broadcast %cst_23 : f32 to vector<8x512xf32>
    %59 = arith.subf %58, %55 : vector<8x512xf32>
    %60 = arith.select %57, %59, %55 : vector<8x512xi1>, vector<8x512xf32>
    %cst_24 = arith.constant 1.000000e+00 : f32
    %61 = vector.broadcast %cst_24 : f32 to vector<8x512xf32>
    %62 = arith.addf %61, %60 : vector<8x512xf32>
    %63 = arith.mulf %25, %62 : vector<8x512xf32>
    %c0_25 = arith.constant 0 : index
    %c0_26 = arith.constant 0 : index
    %c0_27 = arith.constant 0 : index
    %64 = vector.load %arg3[%c0_25, %c0_26, %c0_27] : memref<1x8x512xf32, #tpu.memory_space<vmem>>, vector<1x8x512xf32>
    %65 = vector.shape_cast %64 : vector<1x8x512xf32> to vector<8x512xf32>
    %66 = vector.shape_cast %63 : vector<8x512xf32> to vector<1x8x512xf32>
    tpu.vector_store %arg3[%c0_25, %c0_26, %c0_27], %66 {strides = array<i32>} : memref<1x8x512xf32, #tpu.memory_space<vmem>>, vector<1x8x512xf32>,
    return
  }
  func.func @transform_0(%arg0: i32) -> (i32, i32, i32) {
    %c0_i32 = arith.constant 0 : i32
    %c0_i32_0 = arith.constant 0 : i32
    %c0_i32_1 = arith.constant 0 : i32
    return %arg0, %c0_i32, %c0_i32_0 : i32, i32, i32
  }
  func.func @transform_1(%arg0: i32) -> (i32, i32) {
    %c0_i32 = arith.constant 0 : i32
    %c0_i32_0 = arith.constant 0 : i32
    %c0_i32_1 = arith.constant 0 : i32
    return %c0_i32, %c0_i32_0 : i32, i32
  }
  func.func @transform_2(%arg0: i32) -> (i32, i32, i32) {
    %c0_i32 = arith.constant 0 : i32
    %c0_i32_0 = arith.constant 0 : i32
    %c0_i32_1 = arith.constant 0 : i32
    return %arg0, %c0_i32, %c0_i32_0 : i32, i32, i32
  }
}

module attributes {stable_mosaic.version = 11 : i64} {
  func.func @_mm_in_gelu_kernel(%arg0: i32, %arg1: memref<1x216x512xbf16, #tpu.memory_space<vmem>>, %arg2: memref<8x216xbf16, #tpu.memory_space<vmem>>, %arg3: memref<1x8x512xf32, #tpu.memory_space<vmem>>) attributes {dimension_semantics = [#tpu.dimension_semantics<parallel>], iteration_bounds = array<i64: 2>, scalar_prefetch = 0 : i64, scratch_operands = 0 : i64, tpu.core_type = #tpu.core_type<tc>, window_params = [{transform_indices = @transform_0, window_bounds = array<i64: 1, 216, 512>}, {pipeline_mode = #tpu.pipeline_mode<synchronous>, transform_indices = @transform_1, window_bounds = array<i64: 8, 216>}, {transform_indices = @transform_2, window_bounds = array<i64: 1, 8, 512>}]} {
    %c0 = arith.constant 0 : index
    %c0_0 = arith.constant 0 : index
    %c0_1 = arith.constant 0 : index
    %0 = vector.load %arg1[%c0, %c0_0, %c0_1] : memref<1x216x512xbf16, #tpu.memory_space<vmem>>, vector<1x216x512xbf16>
    %1 = vector.shape_cast %0 : vector<1x216x512xbf16> to vector<216x512xbf16>
    %c0_2 = arith.constant 0 : index
    %c0_3 = arith.constant 0 : index
    %2 = vector.load %arg2[%c0_2, %c0_3] : memref<8x216xbf16, #tpu.memory_space<vmem>>, vector<8x216xbf16>
    %cst = arith.constant dense<0.000000e+00> : vector<8x512xf32>
    %3 = tpu.matmul %2, %1, %cst {dimension_numbers = #tpu.dot_dimension_numbers<[1], [0], [0], [1], [0, 0, 1, 1], [], []>} : vector<8x216xbf16>, vector<216x512xbf16>, vector<8x512xf32> -> vector<8x512xf32>
    %cst_4 = arith.constant dense<0.000000e+00> : vector<8xf32>
    %4 = vector.multi_reduction <add>, %3, %cst_4 [1] : vector<8x512xf32> to vector<8xf32>
    %5 = vector.shape_cast %4 : vector<8xf32> to vector<8x1xf32>
    %6 = arith.mulf %3, %3 : vector<8x512xf32>
    %cst_5 = arith.constant dense<0.000000e+00> : vector<8xf32>
    %7 = vector.multi_reduction <add>, %6, %cst_5 [1] : vector<8x512xf32> to vector<8xf32>
    %8 = vector.shape_cast %7 : vector<8xf32> to vector<8x1xf32>
    %cst_6 = arith.constant 0.001953125 : f32
    %9 = vector.broadcast %cst_6 : f32 to vector<8x1xf32>
    %10 = arith.mulf %5, %9 : vector<8x1xf32>
    %cst_7 = arith.constant 0.001953125 : f32
    %11 = vector.broadcast %cst_7 : f32 to vector<8x1xf32>
    %12 = arith.mulf %8, %11 : vector<8x1xf32>
    %13 = arith.mulf %10, %10 : vector<8x1xf32>
    %14 = arith.subf %12, %13 : vector<8x1xf32>
    %cst_8 = arith.constant 0.000000e+00 : f32
    %15 = vector.broadcast %cst_8 : f32 to vector<8x1xf32>
    %16 = arith.maximumf %14, %15 : vector<8x1xf32>
    %17 = vector.broadcast %10 : vector<8x1xf32> to vector<8x512xf32>
    %18 = arith.subf %3, %17 : vector<8x512xf32>
    %cst_9 = arith.constant 9.99999974E-6 : f32
    %19 = vector.broadcast %cst_9 : f32 to vector<8x1xf32>
    %20 = arith.addf %16, %19 : vector<8x1xf32>
    %21 = math.rsqrt %20 : vector<8x1xf32>
    %22 = vector.broadcast %21 : vector<8x1xf32> to vector<8x512xf32>
    %23 = arith.mulf %18, %22 : vector<8x512xf32>
    %cst_10 = arith.constant 5.000000e-01 : f32
    %24 = vector.broadcast %cst_10 : f32 to vector<8x512xf32>
    %25 = arith.mulf %24, %23 : vector<8x512xf32>
    %cst_11 = arith.constant 0.707106769 : f32
    %26 = vector.broadcast %cst_11 : f32 to vector<8x512xf32>
    %27 = arith.mulf %23, %26 : vector<8x512xf32>
    %28 = math.absf %27 : vector<8x512xf32>
    %cst_12 = arith.constant 0.327591091 : f32
    %29 = vector.broadcast %cst_12 : f32 to vector<8x512xf32>
    %30 = arith.mulf %29, %28 : vector<8x512xf32>
    %cst_13 = arith.constant 1.000000e+00 : f32
    %31 = vector.broadcast %cst_13 : f32 to vector<8x512xf32>
    %32 = arith.addf %31, %30 : vector<8x512xf32>
    %cst_14 = arith.constant 1.000000e+00 : f32
    %33 = vector.broadcast %cst_14 : f32 to vector<8x512xf32>
    %34 = arith.divf %33, %32 : vector<8x512xf32>
    %cst_15 = arith.constant 1.06140542 : f32
    %35 = vector.broadcast %cst_15 : f32 to vector<8x512xf32>
    %36 = arith.mulf %35, %34 : vector<8x512xf32>
    %cst_16 = arith.constant -1.45315206 : f32
    %37 = vector.broadcast %cst_16 : f32 to vector<8x512xf32>
    %38 = arith.addf %36, %37 : vector<8x512xf32>
    %39 = arith.mulf %38, %34 : vector<8x512xf32>
    %cst_17 = arith.constant 1.42141378 : f32
    %40 = vector.broadcast %cst_17 : f32 to vector<8x512xf32>
    %41 = arith.addf %39, %40 : vector<8x512xf32>
    %42 = arith.mulf %41, %34 : vector<8x512xf32>
    %cst_18 = arith.constant -0.284496725 : f32
    %43 = vector.broadcast %cst_18 : f32 to vector<8x512xf32>
    %44 = arith.addf %42, %43 : vector<8x512xf32>
    %45 = arith.mulf %44, %34 : vector<8x512xf32>
    %cst_19 = arith.constant 0.254829586 : f32
    %46 = vector.broadcast %cst_19 : f32 to vector<8x512xf32>
    %47 = arith.addf %45, %46 : vector<8x512xf32>
    %48 = arith.mulf %47, %34 : vector<8x512xf32>
    %49 = arith.mulf %28, %28 : vector<8x512xf32>
    %cst_20 = arith.constant 0.000000e+00 : f32
    %50 = vector.broadcast %cst_20 : f32 to vector<8x512xf32>
    %51 = arith.subf %50, %49 : vector<8x512xf32>
    %52 = math.exp %51 : vector<8x512xf32>
    %53 = arith.mulf %48, %52 : vector<8x512xf32>
    %cst_21 = arith.constant 1.000000e+00 : f32
    %54 = vector.broadcast %cst_21 : f32 to vector<8x512xf32>
    %55 = arith.subf %54, %53 : vector<8x512xf32>
    %cst_22 = arith.constant 0.000000e+00 : f32
    %56 = vector.broadcast %cst_22 : f32 to vector<8x512xf32>
    %57 = arith.cmpf olt, %27, %56 : vector<8x512xf32>
    %cst_23 = arith.constant 0.000000e+00 : f32
    %58 = vector.broadcast %cst_23 : f32 to vector<8x512xf32>
    %59 = arith.subf %58, %55 : vector<8x512xf32>
    %60 = arith.select %57, %59, %55 : vector<8x512xi1>, vector<8x512xf32>
    %cst_24 = arith.constant 1.000000e+00 : f32
    %61 = vector.broadcast %cst_24 : f32 to vector<8x512xf32>
    %62 = arith.addf %61, %60 : vector<8x512xf32>
    %63 = arith.mulf %25, %62 : vector<8x512xf32>
    %c0_25 = arith.constant 0 : index
    %c0_26 = arith.constant 0 : index
    %c0_27 = arith.constant 0 : index
    %64 = vector.load %arg3[%c0_25, %c0_26, %c0_27] : memref<1x8x512xf32, #tpu.memory_space<vmem>>, vector<1x8x512xf32>
    %65 = vector.shape_cast %64 : vector<1x8x512xf32> to vector<8x512xf32>
    %66 = vector.shape_cast %63 : vector<8x512xf32> to vector<1x8x512xf32>
    tpu.vector_store %arg3[%c0_25, %c0_26, %c0_27], %66 {strides = array<i32>} : memref<1x8x512xf32, #tpu.memory_space<vmem>>, vector<1x8x512xf32>,
    return
  }
  func.func @transform_0(%arg0: i32) -> (i32, i32, i32) {
    %c0_i32 = arith.constant 0 : i32
    %c0_i32_0 = arith.constant 0 : i32
    %c0_i32_1 = arith.constant 0 : i32
    return %arg0, %c0_i32, %c0_i32_0 : i32, i32, i32
  }
  func.func @transform_1(%arg0: i32) -> (i32, i32) {
    %c0_i32 = arith.constant 0 : i32
    %c0_i32_0 = arith.constant 0 : i32
    %c0_i32_1 = arith.constant 0 : i32
    return %c0_i32, %c0_i32_0 : i32, i32
  }
  func.func @transform_2(%arg0: i32) -> (i32, i32, i32) {
    %c0_i32 = arith.constant 0 : i32
    %c0_i32_0 = arith.constant 0 : i32
    %c0_i32_1 = arith.constant 0 : i32
    return %arg0, %c0_i32, %c0_i32_0 : i32, i32, i32
  }
}

module attributes {stable_mosaic.version = 11 : i64} {
  func.func @_double_mm_in_gelu_kernel(%arg0: i32, %arg1: memref<1x8x320xf32, #tpu.memory_space<vmem>>, %arg2: memref<8x8xbf16, #tpu.memory_space<vmem>>, %arg3: memref<8x8xbf16, #tpu.memory_space<vmem>>, %arg4: memref<1x8x320xf32, #tpu.memory_space<vmem>>) attributes {dimension_semantics = [#tpu.dimension_semantics<parallel>], iteration_bounds = array<i64: 2>, scalar_prefetch = 0 : i64, scratch_operands = 0 : i64, tpu.core_type = #tpu.core_type<tc>, window_params = [{transform_indices = @transform_0, window_bounds = array<i64: 1, 8, 320>}, {pipeline_mode = #tpu.pipeline_mode<synchronous>, transform_indices = @transform_1, window_bounds = array<i64: 8, 8>}, {pipeline_mode = #tpu.pipeline_mode<synchronous>, transform_indices = @transform_2, window_bounds = array<i64: 8, 8>}, {transform_indices = @transform_3, window_bounds = array<i64: 1, 8, 320>}]} {
    %c0 = arith.constant 0 : index
    %c0_0 = arith.constant 0 : index
    %c0_1 = arith.constant 0 : index
    %0 = vector.load %arg1[%c0, %c0_0, %c0_1] : memref<1x8x320xf32, #tpu.memory_space<vmem>>, vector<1x8x320xf32>
    %1 = vector.shape_cast %0 : vector<1x8x320xf32> to vector<8x320xf32>
    %2 = arith.truncf %1 : vector<8x320xf32> to vector<8x320xbf16>
    %c0_2 = arith.constant 0 : index
    %c0_3 = arith.constant 0 : index
    %3 = vector.load %arg2[%c0_2, %c0_3] : memref<8x8xbf16, #tpu.memory_space<vmem>>, vector<8x8xbf16>
    %cst = arith.constant dense<0.000000e+00> : vector<8x320xf32>
    %4 = tpu.matmul %3, %2, %cst {dimension_numbers = #tpu.dot_dimension_numbers<[1], [0], [0], [1], [0, 0, 1, 1], [], []>} : vector<8x8xbf16>, vector<8x320xbf16>, vector<8x320xf32> -> vector<8x320xf32>
    %cst_4 = arith.constant dense<0.000000e+00> : vector<8xf32>
    %5 = vector.multi_reduction <add>, %4, %cst_4 [1] : vector<8x320xf32> to vector<8xf32>
    %6 = vector.shape_cast %5 : vector<8xf32> to vector<8x1xf32>
    %7 = arith.mulf %4, %4 : vector<8x320xf32>
    %cst_5 = arith.constant dense<0.000000e+00> : vector<8xf32>
    %8 = vector.multi_reduction <add>, %7, %cst_5 [1] : vector<8x320xf32> to vector<8xf32>
    %9 = vector.shape_cast %8 : vector<8xf32> to vector<8x1xf32>
    %cst_6 = arith.constant 3.125000e-03 : f32
    %10 = vector.broadcast %cst_6 : f32 to vector<8x1xf32>
    %11 = arith.mulf %6, %10 : vector<8x1xf32>
    %cst_7 = arith.constant 3.125000e-03 : f32
    %12 = vector.broadcast %cst_7 : f32 to vector<8x1xf32>
    %13 = arith.mulf %9, %12 : vector<8x1xf32>
    %14 = arith.mulf %11, %11 : vector<8x1xf32>
    %15 = arith.subf %13, %14 : vector<8x1xf32>
    %cst_8 = arith.constant 0.000000e+00 : f32
    %16 = vector.broadcast %cst_8 : f32 to vector<8x1xf32>
    %17 = arith.maximumf %15, %16 : vector<8x1xf32>
    %18 = vector.broadcast %11 : vector<8x1xf32> to vector<8x320xf32>
    %19 = arith.subf %4, %18 : vector<8x320xf32>
    %cst_9 = arith.constant 9.99999974E-6 : f32
    %20 = vector.broadcast %cst_9 : f32 to vector<8x1xf32>
    %21 = arith.addf %17, %20 : vector<8x1xf32>
    %22 = math.rsqrt %21 : vector<8x1xf32>
    %23 = vector.broadcast %22 : vector<8x1xf32> to vector<8x320xf32>
    %24 = arith.mulf %19, %23 : vector<8x320xf32>
    %cst_10 = arith.constant 5.000000e-01 : f32
    %25 = vector.broadcast %cst_10 : f32 to vector<8x320xf32>
    %26 = arith.mulf %25, %24 : vector<8x320xf32>
    %cst_11 = arith.constant 0.707106769 : f32
    %27 = vector.broadcast %cst_11 : f32 to vector<8x320xf32>
    %28 = arith.mulf %24, %27 : vector<8x320xf32>
    %29 = math.absf %28 : vector<8x320xf32>
    %cst_12 = arith.constant 0.327591091 : f32
    %30 = vector.broadcast %cst_12 : f32 to vector<8x320xf32>
    %31 = arith.mulf %30, %29 : vector<8x320xf32>
    %cst_13 = arith.constant 1.000000e+00 : f32
    %32 = vector.broadcast %cst_13 : f32 to vector<8x320xf32>
    %33 = arith.addf %32, %31 : vector<8x320xf32>
    %cst_14 = arith.constant 1.000000e+00 : f32
    %34 = vector.broadcast %cst_14 : f32 to vector<8x320xf32>
    %35 = arith.divf %34, %33 : vector<8x320xf32>
    %cst_15 = arith.constant 1.06140542 : f32
    %36 = vector.broadcast %cst_15 : f32 to vector<8x320xf32>
    %37 = arith.mulf %36, %35 : vector<8x320xf32>
    %cst_16 = arith.constant -1.45315206 : f32
    %38 = vector.broadcast %cst_16 : f32 to vector<8x320xf32>
    %39 = arith.addf %37, %38 : vector<8x320xf32>
    %40 = arith.mulf %39, %35 : vector<8x320xf32>
    %cst_17 = arith.constant 1.42141378 : f32
    %41 = vector.broadcast %cst_17 : f32 to vector<8x320xf32>
    %42 = arith.addf %40, %41 : vector<8x320xf32>
    %43 = arith.mulf %42, %35 : vector<8x320xf32>
    %cst_18 = arith.constant -0.284496725 : f32
    %44 = vector.broadcast %cst_18 : f32 to vector<8x320xf32>
    %45 = arith.addf %43, %44 : vector<8x320xf32>
    %46 = arith.mulf %45, %35 : vector<8x320xf32>
    %cst_19 = arith.constant 0.254829586 : f32
    %47 = vector.broadcast %cst_19 : f32 to vector<8x320xf32>
    %48 = arith.addf %46, %47 : vector<8x320xf32>
    %49 = arith.mulf %48, %35 : vector<8x320xf32>
    %50 = arith.mulf %29, %29 : vector<8x320xf32>
    %cst_20 = arith.constant 0.000000e+00 : f32
    %51 = vector.broadcast %cst_20 : f32 to vector<8x320xf32>
    %52 = arith.subf %51, %50 : vector<8x320xf32>
    %53 = math.exp %52 : vector<8x320xf32>
    %54 = arith.mulf %49, %53 : vector<8x320xf32>
    %cst_21 = arith.constant 1.000000e+00 : f32
    %55 = vector.broadcast %cst_21 : f32 to vector<8x320xf32>
    %56 = arith.subf %55, %54 : vector<8x320xf32>
    %cst_22 = arith.constant 0.000000e+00 : f32
    %57 = vector.broadcast %cst_22 : f32 to vector<8x320xf32>
    %58 = arith.cmpf olt, %28, %57 : vector<8x320xf32>
    %cst_23 = arith.constant 0.000000e+00 : f32
    %59 = vector.broadcast %cst_23 : f32 to vector<8x320xf32>
    %60 = arith.subf %59, %56 : vector<8x320xf32>
    %61 = arith.select %58, %60, %56 : vector<8x320xi1>, vector<8x320xf32>
    %cst_24 = arith.constant 1.000000e+00 : f32
    %62 = vector.broadcast %cst_24 : f32 to vector<8x320xf32>
    %63 = arith.addf %62, %61 : vector<8x320xf32>
    %64 = arith.mulf %26, %63 : vector<8x320xf32>
    %c0_25 = arith.constant 0 : index
    %c0_26 = arith.constant 0 : index
    %65 = vector.load %arg3[%c0_25, %c0_26] : memref<8x8xbf16, #tpu.memory_space<vmem>>, vector<8x8xbf16>
    %66 = arith.truncf %64 : vector<8x320xf32> to vector<8x320xbf16>
    %cst_27 = arith.constant dense<0.000000e+00> : vector<8x320xf32>
    %67 = tpu.matmul %65, %66, %cst_27 {dimension_numbers = #tpu.dot_dimension_numbers<[1], [0], [0], [1], [0, 0, 1, 1], [], []>} : vector<8x8xbf16>, vector<8x320xbf16>, vector<8x320xf32> -> vector<8x320xf32>
    %cst_28 = arith.constant dense<0.000000e+00> : vector<8xf32>
    %68 = vector.multi_reduction <add>, %67, %cst_28 [1] : vector<8x320xf32> to vector<8xf32>
    %69 = vector.shape_cast %68 : vector<8xf32> to vector<8x1xf32>
    %70 = arith.mulf %67, %67 : vector<8x320xf32>
    %cst_29 = arith.constant dense<0.000000e+00> : vector<8xf32>
    %71 = vector.multi_reduction <add>, %70, %cst_29 [1] : vector<8x320xf32> to vector<8xf32>
    %72 = vector.shape_cast %71 : vector<8xf32> to vector<8x1xf32>
    %cst_30 = arith.constant 3.125000e-03 : f32
    %73 = vector.broadcast %cst_30 : f32 to vector<8x1xf32>
    %74 = arith.mulf %69, %73 : vector<8x1xf32>
    %cst_31 = arith.constant 3.125000e-03 : f32
    %75 = vector.broadcast %cst_31 : f32 to vector<8x1xf32>
    %76 = arith.mulf %72, %75 : vector<8x1xf32>
    %77 = arith.mulf %74, %74 : vector<8x1xf32>
    %78 = arith.subf %76, %77 : vector<8x1xf32>
    %cst_32 = arith.constant 0.000000e+00 : f32
    %79 = vector.broadcast %cst_32 : f32 to vector<8x1xf32>
    %80 = arith.maximumf %78, %79 : vector<8x1xf32>
    %81 = vector.broadcast %74 : vector<8x1xf32> to vector<8x320xf32>
    %82 = arith.subf %67, %81 : vector<8x320xf32>
    %cst_33 = arith.constant 9.99999974E-6 : f32
    %83 = vector.broadcast %cst_33 : f32 to vector<8x1xf32>
    %84 = arith.addf %80, %83 : vector<8x1xf32>
    %85 = math.rsqrt %84 : vector<8x1xf32>
    %86 = vector.broadcast %85 : vector<8x1xf32> to vector<8x320xf32>
    %87 = arith.mulf %82, %86 : vector<8x320xf32>
    %cst_34 = arith.constant 5.000000e-01 : f32
    %88 = vector.broadcast %cst_34 : f32 to vector<8x320xf32>
    %89 = arith.mulf %88, %87 : vector<8x320xf32>
    %cst_35 = arith.constant 0.707106769 : f32
    %90 = vector.broadcast %cst_35 : f32 to vector<8x320xf32>
    %91 = arith.mulf %87, %90 : vector<8x320xf32>
    %92 = math.absf %91 : vector<8x320xf32>
    %cst_36 = arith.constant 0.327591091 : f32
    %93 = vector.broadcast %cst_36 : f32 to vector<8x320xf32>
    %94 = arith.mulf %93, %92 : vector<8x320xf32>
    %cst_37 = arith.constant 1.000000e+00 : f32
    %95 = vector.broadcast %cst_37 : f32 to vector<8x320xf32>
    %96 = arith.addf %95, %94 : vector<8x320xf32>
    %cst_38 = arith.constant 1.000000e+00 : f32
    %97 = vector.broadcast %cst_38 : f32 to vector<8x320xf32>
    %98 = arith.divf %97, %96 : vector<8x320xf32>
    %cst_39 = arith.constant 1.06140542 : f32
    %99 = vector.broadcast %cst_39 : f32 to vector<8x320xf32>
    %100 = arith.mulf %99, %98 : vector<8x320xf32>
    %cst_40 = arith.constant -1.45315206 : f32
    %101 = vector.broadcast %cst_40 : f32 to vector<8x320xf32>
    %102 = arith.addf %100, %101 : vector<8x320xf32>
    %103 = arith.mulf %102, %98 : vector<8x320xf32>
    %cst_41 = arith.constant 1.42141378 : f32
    %104 = vector.broadcast %cst_41 : f32 to vector<8x320xf32>
    %105 = arith.addf %103, %104 : vector<8x320xf32>
    %106 = arith.mulf %105, %98 : vector<8x320xf32>
    %cst_42 = arith.constant -0.284496725 : f32
    %107 = vector.broadcast %cst_42 : f32 to vector<8x320xf32>
    %108 = arith.addf %106, %107 : vector<8x320xf32>
    %109 = arith.mulf %108, %98 : vector<8x320xf32>
    %cst_43 = arith.constant 0.254829586 : f32
    %110 = vector.broadcast %cst_43 : f32 to vector<8x320xf32>
    %111 = arith.addf %109, %110 : vector<8x320xf32>
    %112 = arith.mulf %111, %98 : vector<8x320xf32>
    %113 = arith.mulf %92, %92 : vector<8x320xf32>
    %cst_44 = arith.constant 0.000000e+00 : f32
    %114 = vector.broadcast %cst_44 : f32 to vector<8x320xf32>
    %115 = arith.subf %114, %113 : vector<8x320xf32>
    %116 = math.exp %115 : vector<8x320xf32>
    %117 = arith.mulf %112, %116 : vector<8x320xf32>
    %cst_45 = arith.constant 1.000000e+00 : f32
    %118 = vector.broadcast %cst_45 : f32 to vector<8x320xf32>
    %119 = arith.subf %118, %117 : vector<8x320xf32>
    %cst_46 = arith.constant 0.000000e+00 : f32
    %120 = vector.broadcast %cst_46 : f32 to vector<8x320xf32>
    %121 = arith.cmpf olt, %91, %120 : vector<8x320xf32>
    %cst_47 = arith.constant 0.000000e+00 : f32
    %122 = vector.broadcast %cst_47 : f32 to vector<8x320xf32>
    %123 = arith.subf %122, %119 : vector<8x320xf32>
    %124 = arith.select %121, %123, %119 : vector<8x320xi1>, vector<8x320xf32>
    %cst_48 = arith.constant 1.000000e+00 : f32
    %125 = vector.broadcast %cst_48 : f32 to vector<8x320xf32>
    %126 = arith.addf %125, %124 : vector<8x320xf32>
    %127 = arith.mulf %89, %126 : vector<8x320xf32>
    %c0_49 = arith.constant 0 : index
    %c0_50 = arith.constant 0 : index
    %c0_51 = arith.constant 0 : index
    %128 = vector.load %arg4[%c0_49, %c0_50, %c0_51] : memref<1x8x320xf32, #tpu.memory_space<vmem>>, vector<1x8x320xf32>
    %129 = vector.shape_cast %128 : vector<1x8x320xf32> to vector<8x320xf32>
    %130 = vector.shape_cast %127 : vector<8x320xf32> to vector<1x8x320xf32>
    tpu.vector_store %arg4[%c0_49, %c0_50, %c0_51], %130 {strides = array<i32>} : memref<1x8x320xf32, #tpu.memory_space<vmem>>, vector<1x8x320xf32>,
    return
  }
  func.func @transform_0(%arg0: i32) -> (i32, i32, i32) {
    %c0_i32 = arith.constant 0 : i32
    %c0_i32_0 = arith.constant 0 : i32
    %c0_i32_1 = arith.constant 0 : i32
    return %arg0, %c0_i32, %c0_i32_0 : i32, i32, i32
  }
  func.func @transform_1(%arg0: i32) -> (i32, i32) {
    %c0_i32 = arith.constant 0 : i32
    %c0_i32_0 = arith.constant 0 : i32
    %c0_i32_1 = arith.constant 0 : i32
    return %c0_i32, %c0_i32_0 : i32, i32
  }
  func.func @transform_2(%arg0: i32) -> (i32, i32) {
    %c0_i32 = arith.constant 0 : i32
    %c0_i32_0 = arith.constant 0 : i32
    %c0_i32_1 = arith.constant 0 : i32
    return %c0_i32, %c0_i32_0 : i32, i32
  }
  func.func @transform_3(%arg0: i32) -> (i32, i32, i32) {
    %c0_i32 = arith.constant 0 : i32
    %c0_i32_0 = arith.constant 0 : i32
    %c0_i32_1 = arith.constant 0 : i32
    return %arg0, %c0_i32, %c0_i32_0 : i32, i32, i32
  }
}

module attributes {stable_mosaic.version = 11 : i64} {
  func.func @_add3_kernel(%arg0: i32, %arg1: memref<1x8x512xf32, #tpu.memory_space<vmem>>, %arg2: memref<1x8x512xf32, #tpu.memory_space<vmem>>, %arg3: memref<1x8x512xf32, #tpu.memory_space<vmem>>, %arg4: memref<1x8x512xf32, #tpu.memory_space<vmem>>) attributes {dimension_semantics = [#tpu.dimension_semantics<parallel>], iteration_bounds = array<i64: 2>, scalar_prefetch = 0 : i64, scratch_operands = 0 : i64, tpu.core_type = #tpu.core_type<tc>, window_params = [{transform_indices = @transform_0, window_bounds = array<i64: 1, 8, 512>}, {transform_indices = @transform_1, window_bounds = array<i64: 1, 8, 512>}, {transform_indices = @transform_2, window_bounds = array<i64: 1, 8, 512>}, {transform_indices = @transform_3, window_bounds = array<i64: 1, 8, 512>}]} {
    %c0 = arith.constant 0 : index
    %c0_0 = arith.constant 0 : index
    %c0_1 = arith.constant 0 : index
    %0 = vector.load %arg1[%c0, %c0_0, %c0_1] : memref<1x8x512xf32, #tpu.memory_space<vmem>>, vector<1x8x512xf32>
    %c0_2 = arith.constant 0 : index
    %c0_3 = arith.constant 0 : index
    %c0_4 = arith.constant 0 : index
    %1 = vector.load %arg2[%c0_2, %c0_3, %c0_4] : memref<1x8x512xf32, #tpu.memory_space<vmem>>, vector<1x8x512xf32>
    %2 = arith.addf %0, %1 : vector<1x8x512xf32>
    %c0_5 = arith.constant 0 : index
    %c0_6 = arith.constant 0 : index
    %c0_7 = arith.constant 0 : index
    %3 = vector.load %arg3[%c0_5, %c0_6, %c0_7] : memref<1x8x512xf32, #tpu.memory_space<vmem>>, vector<1x8x512xf32>
    %4 = arith.addf %2, %3 : vector<1x8x512xf32>
    %c0_8 = arith.constant 0 : index
    %c0_9 = arith.constant 0 : index
    %c0_10 = arith.constant 0 : index
    %5 = vector.load %arg4[%c0_8, %c0_9, %c0_10] : memref<1x8x512xf32, #tpu.memory_space<vmem>>, vector<1x8x512xf32>
    tpu.vector_store %arg4[%c0_8, %c0_9, %c0_10], %4 {strides = array<i32>} : memref<1x8x512xf32, #tpu.memory_space<vmem>>, vector<1x8x512xf32>,
    return
  }
  func.func @transform_0(%arg0: i32) -> (i32, i32, i32) {
    %c0_i32 = arith.constant 0 : i32
    %c0_i32_0 = arith.constant 0 : i32
    %c0_i32_1 = arith.constant 0 : i32
    return %arg0, %c0_i32, %c0_i32_0 : i32, i32, i32
  }
  func.func @transform_1(%arg0: i32) -> (i32, i32, i32) {
    %c0_i32 = arith.constant 0 : i32
    %c0_i32_0 = arith.constant 0 : i32
    %c0_i32_1 = arith.constant 0 : i32
    return %arg0, %c0_i32, %c0_i32_0 : i32, i32, i32
  }
  func.func @transform_2(%arg0: i32) -> (i32, i32, i32) {
    %c0_i32 = arith.constant 0 : i32
    %c0_i32_0 = arith.constant 0 : i32
    %c0_i32_1 = arith.constant 0 : i32
    return %arg0, %c0_i32, %c0_i32_0 : i32, i32, i32
  }
  func.func @transform_3(%arg0: i32) -> (i32, i32, i32) {
    %c0_i32 = arith.constant 0 : i32
    %c0_i32_0 = arith.constant 0 : i32
    %c0_i32_1 = arith.constant 0 : i32
    return %arg0, %c0_i32, %c0_i32_0 : i32, i32, i32
  }
}

</mosaic_0001>

<bundles_post_ra>
// kernel: down_block_forward.6
= control target key start
LH: loop header
LB: loop body
LE: loop exit
PB: predicated region body
PF: predicated region fallthrough
CT: control target
= control target key end

     0   :  { %s742_s9 = smov 0   ;;  %s828_s0 = inlined_call_operand.vmem [shape: bf16[2,108,512], index: 0, kind: input, shape index: {}]   ;;  %s829_s1 = inlined_call_operand.vmem [shape: bf16[8,108], index: 1, kind: input, shape index: {}]   ;;  %s830_s2 = inlined_call_operand.vmem [shape: f32[2,8,512], index: 2, kind: output, shape index: {}]  }
   0x1 LB: > { %s605_s10 = sadd.s32 4294967295, %s724_s9   ;;  %p609_p0 = scmp.ge.s32.totalorder %s724_s9, 1  ;;  %s724_s9 = sphi %s742_s9, %s12_s9  }
   0x2   : > { %p112_p1 = scmp.lt.s32.totalorder %s724_s9, 3 }
   0x4   : > { %p113_p2 = pnand %p609_p0, %p112_p1 }
   0x5   : > { %p134_p3 = scmp.lt.s32.totalorder (!%p113_p2), %s605_s10, 1 }
   0x6   : > { %116 = sbr.rel (%p113_p2) target bundleno = 467 (0x1d3), region = 28 }
   0xb   : > { %v726_v0 = vmov 0   ;;  %s832_s10 = smov (!%p134_p3, %s605_s10), 1  ;;  %vm314_vm0 = vcmask 1045504   ;;  %v173_v31 = vld [vmem:[%s829_s1] sm:$0xf]  ;;  %vm310_vm1 = vcmask 883712  }
   0xc   : > { %359 = vmatprep.mubr.bf16.mxu0 %v726_v0  ;;  %400 = vmatprep.mubr.bf16.mxu1 %v726_v0  ;;  %s648_s11 = smul.u32 224, %s832_s10  ;;  %s647_s17 = sshll.u32 %s832_s10, 5 }
   0xd   : > { %s143_s20 = scalar_lea.vmem %s830_s2, %s647_s17 }
   0xe   : > { %s756_s14 = scalar_lea.vmem %s828_s0, %s648_s11 }
   0xf   : > { %v658_v1 = vld [vmem:[%s756_s14 + $0xc4] ss:$16 sps:$4 sm:$0x3f]   ;;  %v660_v2 = vld [vmem:[%s756_s14 + $0xcc] ss:$16 sps:$4 sm:$0x3f]  }
  0x10   : > { %641 = vmatprep.subr.msk.bf16.mxu0 %vm314_vm0, %v658_v1  ;;  %v662_v3 = vld [vmem:[%s756_s14 + $0xc0] ss:$16 sps:$4 sm:$0x3f]   ;;  %v663_v4 = vld [vmem:[%s756_s14 + $0xc8] ss:$16 sps:$4 sm:$0x3f]   ;;  %643 = vmatprep.subr.msk.bf16.mxu1 %vm314_vm0, %v660_v2 }
  0x11   : > { %v664_v5 = vld [vmem:[%s756_s14 + $0xa4] ss:$16 sps:$4 sm:$0xff]   ;;  %v316_v6 = vsel %vm314_vm0, %v662_v3, 0  ;;  %v322_v7 = vsel %vm314_vm0, %v663_v4, 0  ;;  %v666_v8 = vld [vmem:[%s756_s14 + $0xac] ss:$16 sps:$4 sm:$0xff]  }
  0x12   : > { %330 = vmatpush1.bf16.msra.mxu0 %v316_v6  ;;  %371 = vmatpush1.bf16.msra.mxu1 %v322_v7  ;;  %v668_v9 = vld [vmem:[%s756_s14 + $0xa0] ss:$16 sps:$4 sm:$0xff]   ;;  %v669_v10 = vld [vmem:[%s756_s14 + $0xa8] ss:$16 sps:$4 sm:$0xff]   ;;  %v670_v11 = vld [vmem:[%s756_s14 + $0x84] ss:$16 sps:$4 sm:$0xff]  }
  0x13   : > { %331 = vmatprep.subr.bf16.mxu0 %v664_v5  ;;  %372 = vmatprep.subr.bf16.mxu1 %v666_v8  ;;  %v672_v12 = vld [vmem:[%s756_s14 + $0x8c] ss:$16 sps:$4 sm:$0xff]   ;;  %v674_v13 = vld [vmem:[%s756_s14 + $0x80] ss:$16 sps:$4 sm:$0xff]   ;;  %v675_v14 = vld [vmem:[%s756_s14 + $0x88] ss:$16 sps:$4 sm:$0xff]  }
  0x14   : > { %v676_v15 = vld [vmem:[%s756_s14 + $0x64] ss:$16 sps:$4 sm:$0xff]   ;;  %v678_v16 = vld [vmem:[%s756_s14 + $0x6c] ss:$16 sps:$4 sm:$0xff]   ;;  %v680_v17 = vld [vmem:[%s756_s14 + $0x60] ss:$16 sps:$4 sm:$0xff]  }
  0x15   : > { %v681_v18 = vld [vmem:[%s756_s14 + $0x68] ss:$16 sps:$4 sm:$0xff]   ;;  %v682_v19 = vld [vmem:[%s756_s14 + $0x44] ss:$16 sps:$4 sm:$0xff]   ;;  %v684_v20 = vld [vmem:[%s756_s14 + $0x4c] ss:$16 sps:$4 sm:$0xff]  }
  0x16   : > { %332 = vmatpush1.bf16.msra.mxu0 %v668_v9  ;;  %373 = vmatpush1.bf16.msra.mxu1 %v669_v10  ;;  %v686_v21 = vld [vmem:[%s756_s14 + $0x40] ss:$16 sps:$4 sm:$0xff]   ;;  %v687_v22 = vld [vmem:[%s756_s14 + $0x48] ss:$16 sps:$4 sm:$0xff]   ;;  %v688_v23 = vld [vmem:[%s756_s14 + $0x24] ss:$16 sps:$4 sm:$0xff]  }
  0x17   : > { %333 = vmatprep.subr.bf16.mxu0 %v670_v11  ;;  %374 = vmatprep.subr.bf16.mxu1 %v672_v12  ;;  %v690_v24 = vld [vmem:[%s756_s14 + $0x2c] ss:$16 sps:$4 sm:$0xff]   ;;  %v692_v25 = vld [vmem:[%s756_s14 + $0x20] ss:$16 sps:$4 sm:$0xff]   ;;  %v693_v26 = vld [vmem:[%s756_s14 + $0x28] ss:$16 sps:$4 sm:$0xff]  }
  0x18   : > { %v694_v27 = vld [vmem:[%s756_s14 + $0x4] ss:$16 sps:$4 sm:$0xff]   ;;  %v696_v28 = vld [vmem:[%s756_s14 + $0xc] ss:$16 sps:$4 sm:$0xff]   ;;  %v698_v29 = vld [vmem:[%s756_s14] ss:$16 sps:$4 sm:$0xff]  }
  0x19   : > { %v699_v30 = vld [vmem:[%s756_s14 + $0x8] ss:$16 sps:$4 sm:$0xff]  }
  0x1a   : > { %334 = vmatpush1.bf16.msra.mxu0 %v674_v13  ;;  %375 = vmatpush1.bf16.msra.mxu1 %v675_v14 }
  0x1b   : > { %335 = vmatprep.subr.bf16.mxu0 %v676_v15  ;;  %376 = vmatprep.subr.bf16.mxu1 %v678_v16 }
  0x1e   : > { %336 = vmatpush1.bf16.msra.mxu0 %v680_v17  ;;  %377 = vmatpush1.bf16.msra.mxu1 %v681_v18 }
  0x1f   : > { %337 = vmatprep.subr.bf16.mxu0 %v682_v19  ;;  %378 = vmatprep.subr.bf16.mxu1 %v684_v20 }
  0x22   : > { %338 = vmatpush1.bf16.msra.mxu0 %v686_v21  ;;  %379 = vmatpush1.bf16.msra.mxu1 %v687_v22 }
  0x23   : > { %339 = vmatprep.subr.bf16.mxu0 %v688_v23  ;;  %380 = vmatprep.subr.bf16.mxu1 %v690_v24 }
  0x26   : > { %340 = vmatpush1.bf16.msra.mxu0 %v692_v25  ;;  %381 = vmatpush1.bf16.msra.mxu1 %v693_v26 }
  0x27   : > { %341 = vmatprep.subr.bf16.mxu0 %v694_v27  ;;  %382 = vmatprep.subr.bf16.mxu1 %v696_v28 }
  0x2a   : > { %342 = vmatpush1.bf16.msra.mxu0 %v698_v29  ;;  %383 = vmatpush1.bf16.msra.mxu1 %v699_v30 }
  0x2d   : > { %642 = vmatmul.mubr.msk.bf16.vlgmr.msra.gmra.mxu0 %vm310_vm1, %v173_v31  ;;  %644 = vmatmul.mubr.msk.bf16.vlgmr.msra.gmra.mxu1 %vm310_vm1, %v173_v31 }
  0xed   : > { %v361_v32 = vpop.f32.mrf.mxu0  ;;  %v402_v33 = vpop.f32.mrf.mxu1 }
  0xee   : > { %v414_v36 = vmul.f32 %v361_v32, %v361_v32  ;;  %v416_v37 = vmul.f32 %v402_v33, %v402_v33 }
  0xef   : > { %v363_v34 = vpop.f32.mrf.mxu0  ;;  %v404_v35 = vpop.f32.mrf.mxu1 }
  0xf0   : > { %v409_v38 = vadd.f32 %v363_v34, %v361_v32  ;;  %v415_v39 = vmul.f32 %v363_v34, %v363_v34  ;;  %v417_v48 = vmul.f32 %v404_v35, %v404_v35 }
  0xf1   : > { %v365_v40 = vpop.f32.mrf.mxu0  ;;  %v406_v41 = vpop.f32.mrf.mxu1 }
  0xf2   : > { %v410_v42 = vadd.f32 %v409_v38, %v402_v33  ;;  %v418_v43 = vadd.f32 %v415_v39, %v414_v36 }
  0xf3   : > { %v366_v44 = vpop.f32.mrf.mxu0  ;;  %v407_v45 = vpop.f32.mrf.mxu1 }
  0xf4   : > { %v411_v46 = vadd.f32 %v410_v42, %v404_v35  ;;  %v419_v47 = vadd.f32 %v418_v43, %v416_v37 }
  0xf6   : > { %412 = vadd.xlane.f32.xlu0 %v411_v46  ;;  %v420_v49 = vadd.f32 %v419_v47, %v417_v48 }
  0xfa   : > { %421 = vadd.xlane.f32.xlu0 %v420_v49 }
 0x17f   : > { %v413_v50 = vpop.xlane.xlu0 %412 }
 0x180   : > { %v423_v51 = vmul.f32 0.001953125, %v413_v50 }
 0x182   : > { %v425_v53 = vmul.f32 %v423_v51, %v423_v51  ;;  %v428_v58 = vsub.f32 %v361_v32, %v423_v51  ;;  %v429_v59 = vsub.f32 %v363_v34, %v423_v51  ;;  %v430_v60 = vsub.f32 %v402_v33, %v423_v51 }
 0x183   : > { %v422_v52 = vpop.xlane.xlu0 %421  ;;  %v431_v61 = vsub.f32 %v404_v35, %v423_v51 }
 0x184   : > { %v424_v54 = vmul.f32 0.001953125, %v422_v52 }
 0x186   : > { %v426_v55 = vsub.f32 %v424_v54, %v425_v53 }
 0x188   : > { %v427_v56 = vmax.f32 %v426_v55, 0.0 }
 0x18a   : > { %v432_v57 = vadd.f32 1e-05, %v427_v56 }
 0x18c   : > { %700 = vrsqrt.f32 %v432_v57 }
 0x199   : > { %v701_v62 = vpop.eup %700 }
 0x19a   : > { %v789_v63 = vmul.f32 %v701_v62, %v428_v58  ;;  %v791_v0 = vmul.f32 %v701_v62, %v429_v59  ;;  %v793_v1 = vmul.f32 %v701_v62, %v430_v60  ;;  %v795_v2 = vmul.f32 %v701_v62, %v431_v61 }
 0x19c   : > { %v798_v3 = vmul.f32 0.70710677, %v789_v63  ;;  %v801_v4 = vmul.f32 0.70710677, %v791_v0  ;;  %v804_v5 = vmul.f32 0.70710677, %v793_v1 }
 0x19d   : > { %v807_v6 = vmul.f32 0.70710677, %v795_v2 }
 0x19e   : > { %v446_v7 = vand.u32 2147483647, %v798_v3  ;;  %v447_v8 = vand.u32 2147483647, %v801_v4  ;;  %v448_v9 = vand.u32 2147483647, %v804_v5 }
 0x19f   : > { %v449_v10 = vand.u32 2147483647, %v807_v6  ;;  %vm526_vm2 = vcmp.lt.f32.partialorder %v798_v3, 0.0  ;;  %vm527_vm3 = vcmp.lt.f32.partialorder %v801_v4, 0.0  ;;  %vm528_vm4 = vcmp.lt.f32.partialorder %v804_v5, 0.0 }
 0x1a0   : > { %v450_v11 = vmul.f32 0.3275911, %v446_v7  ;;  %v451_v12 = vmul.f32 0.3275911, %v447_v8  ;;  %v452_v13 = vmul.f32 0.3275911, %v448_v9  ;;  %v502_v19 = vmul.f32 %v446_v7, %v446_v7 }
 0x1a1   : > { %v453_v14 = vmul.f32 0.3275911, %v449_v10  ;;  %v503_v20 = vmul.f32 %v447_v8, %v447_v8  ;;  %v504_v21 = vmul.f32 %v448_v9, %v448_v9  ;;  %v505_v22 = vmul.f32 %v449_v10, %v449_v10 }
 0x1a2   : > { %v454_v15 = vadd.f32 1.0, %v450_v11  ;;  %v455_v16 = vadd.f32 1.0, %v451_v12  ;;  %v456_v17 = vadd.f32 1.0, %v452_v13  ;;  %v506_v23 = vsub.f32 0.0, %v502_v19 }
 0x1a3   : > { %v457_v18 = vadd.f32 1.0, %v453_v14  ;;  %v507_v24 = vsub.f32 0.0, %v503_v20  ;;  %v508_v25 = vsub.f32 0.0, %v504_v21  ;;  %v509_v27 = vsub.f32 0.0, %v505_v22 }
 0x1a4   : > { %702 = vrcp.f32 %v454_v15  ;;  %v510_v30 = vmul.f32 1.442695, %v506_v23  ;;  %vm529_vm5 = vcmp.lt.f32.partialorder %v807_v6, 0.0  ;;  %v441_v5 = vmul.f32 0.5, %v795_v2 }
 0x1a5   : > { %704 = vrcp.f32 %v455_v16  ;;  %v512_v33 = vmul.f32 1.442695, %v507_v24  ;;  %v514_v37 = vmul.f32 1.442695, %v508_v25  ;;  %v516_v40 = vmul.f32 1.442695, %v509_v27 }
 0x1a6   : > { %706 = vrcp.f32 %v456_v17 }
 0x1a7   : > { %708 = vrcp.f32 %v457_v18 }
 0x1a8   : > { %710 = vpow2.f32 %v510_v30 }
 0x1a9   : > { %712 = vpow2.f32 %v512_v33 }
 0x1aa   : > { %714 = vpow2.f32 %v514_v37 }
 0x1ab   : > { %716 = vpow2.f32 %v516_v40 }
 0x1b1   : > { %v703_v26 = vpop.eup %702 }
 0x1b2   : > { %v705_v28 = vpop.eup %704  ;;  %v466_v29 = vmul.f32 1.0614054, %v703_v26 }
 0x1b3   : > { %v707_v31 = vpop.eup %706  ;;  %v467_v32 = vmul.f32 1.0614054, %v705_v28 }
 0x1b4   : > { %v709_v34 = vpop.eup %708  ;;  %v468_v35 = vmul.f32 1.0614054, %v707_v31  ;;  %v470_v36 = vadd.f32 -1.4531521, %v466_v29 }
 0x1b5   : > { %v469_v38 = vmul.f32 1.0614054, %v709_v34  ;;  %v471_v39 = vadd.f32 -1.4531521, %v467_v32  ;;  %v711_v11 = vpop.eup %710 }
 0x1b6   : > { %v472_v41 = vadd.f32 -1.4531521, %v468_v35  ;;  %v474_v42 = vmul.f32 %v703_v26, %v470_v36  ;;  %v713_v14 = vpop.eup %712  ;;  %v439_v35 = vmul.f32 0.5, %v791_v0 }
 0x1b7   : > { %v473_v43 = vadd.f32 -1.4531521, %v469_v38  ;;  %v475_v44 = vmul.f32 %v705_v28, %v471_v39  ;;  %v715_v17 = vpop.eup %714 }
 0x1b8   : > { %v476_v45 = vmul.f32 %v707_v31, %v472_v41  ;;  %v478_v46 = vadd.f32 1.4214138, %v474_v42  ;;  %v717_v20 = vpop.eup %716 }
 0x1b9   : > { %v477_v47 = vmul.f32 %v709_v34, %v473_v43  ;;  %v479_v48 = vadd.f32 1.4214138, %v475_v44 }
 0x1ba   : > { %v480_v49 = vadd.f32 1.4214138, %v476_v45  ;;  %v482_v50 = vmul.f32 %v703_v26, %v478_v46 }
 0x1bb   : > { %v481_v51 = vadd.f32 1.4214138, %v477_v47  ;;  %v483_v52 = vmul.f32 %v705_v28, %v479_v48 }
 0x1bc   : > { %v484_v53 = vmul.f32 %v707_v31, %v480_v49  ;;  %v486_v54 = vadd.f32 -0.28449672, %v482_v50 }
 0x1bd   : > { %v485_v55 = vmul.f32 %v709_v34, %v481_v51  ;;  %v487_v56 = vadd.f32 -0.28449672, %v483_v52 }
 0x1be   : > { %v488_v57 = vadd.f32 -0.28449672, %v484_v53  ;;  %v490_v58 = vmul.f32 %v703_v26, %v486_v54 }
 0x1bf   : > { %v489_v59 = vadd.f32 -0.28449672, %v485_v55  ;;  %v491_v60 = vmul.f32 %v705_v28, %v487_v56 }
 0x1c0   : > { %v492_v61 = vmul.f32 %v707_v31, %v488_v57  ;;  %v494_v62 = vadd.f32 0.2548296, %v490_v58 }
 0x1c1   : > { %v493_v7 = vmul.f32 %v709_v34, %v489_v59  ;;  %v495_v8 = vadd.f32 0.2548296, %v491_v60 }
 0x1c2   : > { %v496_v9 = vadd.f32 0.2548296, %v492_v61  ;;  %v498_v10 = vmul.f32 %v703_v26, %v494_v62 }
 0x1c3   : > { %v497_v12 = vadd.f32 0.2548296, %v493_v7  ;;  %v499_v13 = vmul.f32 %v705_v28, %v495_v8  ;;  %v438_v28 = vmul.f32 0.5, %v789_v63  ;;  %v440_v63 = vmul.f32 0.5, %v793_v1 }
 0x1c4   : > { %v500_v15 = vmul.f32 %v707_v31, %v496_v9  ;;  %v518_v16 = vmul.f32 %v711_v11, %v498_v10 }
 0x1c5   : > { %v501_v18 = vmul.f32 %v709_v34, %v497_v12  ;;  %v519_v19 = vmul.f32 %v713_v14, %v499_v13 }
 0x1c6   : > { %v520_v21 = vmul.f32 %v715_v17, %v500_v15  ;;  %v522_v22 = vsub.f32 1.0, %v518_v16 }
 0x1c7   : > { %v521_v23 = vmul.f32 %v717_v20, %v501_v18  ;;  %v523_v24 = vsub.f32 1.0, %v519_v19 }
 0x1c8   : > { %v524_v25 = vsub.f32 1.0, %v520_v21  ;;  %v530_v27 = vsub.f32 0.0, %v522_v22 }
 0x1c9   : > { %v525_v29 = vsub.f32 1.0, %v521_v23  ;;  %v531_v26 = vsub.f32 0.0, %v523_v24 }
 0x1ca   : > { %v532_v30 = vsub.f32 0.0, %v524_v25  ;;  %v534_v31 = vsel %vm526_vm2, %v530_v27, %v522_v22 }
 0x1cb   : > { %v533_v32 = vsub.f32 0.0, %v525_v29  ;;  %v535_v33 = vsel %vm527_vm3, %v531_v26, %v523_v24  ;;  %v538_v34 = vadd.f32 1.0, %v534_v31 }
 0x1cc   : > { %v536_v3 = vsel %vm528_vm4, %v532_v30, %v524_v25  ;;  %v539_v36 = vadd.f32 1.0, %v535_v33 }
 0x1cd   : > { %v537_v4 = vsel %vm529_vm5, %v533_v32, %v525_v29  ;;  %v540_v37 = vadd.f32 1.0, %v536_v3  ;;  %v542_v38 = vmul.f32 %v538_v34, %v438_v28 }
 0x1ce   : > { %v541_v39 = vadd.f32 1.0, %v537_v4  ;;  %v543_v40 = vmul.f32 %v539_v36, %v439_v35 }
 0x1cf   : > { %v544_v41 = vmul.f32 %v540_v37, %v440_v63  ;;  %546 = vst [vmem:[%s143_s20] sm:$0xff] %v542_v38 }
 0x1d0   : > { %v545_v42 = vmul.f32 %v541_v39, %v441_v5  ;;  %547 = vst [vmem:[%s143_s20 + $0x8] sm:$0xff] %v543_v40 }
 0x1d1   : > { %548 = vst [vmem:[%s143_s20 + $0x10] sm:$0xff] %v544_v41 }
 0x1d2   : > { %549 = vst [vmem:[%s143_s20 + $0x18] sm:$0xff] %v545_v42 }
 0x1d3 PF: > { %s12_s9 = sadd.s32 1, %s724_s9  }
 0x1d4   : > { %p9_p4 = scmp.ge.s32.totalorder %s12_s9, 4  }
 0x1d6   :  { %11 = sbr.rel (!%p9_p4) target bundleno = 1 (0x1), region = 58 }

// kernel: down_block_forward.7
= control target key start
LH: loop header
LB: loop body
LE: loop exit
PB: predicated region body
PF: predicated region fallthrough
CT: control target
= control target key end

     0   :  { %s978_s9 = smov 0   ;;  %s1096_s0 = inlined_call_operand.vmem [shape: bf16[2,216,512], index: 0, kind: input, shape index: {}]   ;;  %s1097_s1 = inlined_call_operand.vmem [shape: bf16[8,216], index: 1, kind: input, shape index: {}]   ;;  %s1098_s2 = inlined_call_operand.vmem [shape: f32[2,8,512], index: 2, kind: output, shape index: {}]  }
   0x1 LB: > { %s771_s10 = sadd.s32 4294967295, %s961_s9   ;;  %p775_p0 = scmp.ge.s32.totalorder %s961_s9, 1  ;;  %s961_s9 = sphi %s978_s9, %s12_s9  }
   0x2   : > { %p112_p1 = scmp.lt.s32.totalorder %s961_s9, 3 }
   0x4   : > { %p113_p2 = pnand %p775_p0, %p112_p1 }
   0x5   : > { %p134_p3 = scmp.lt.s32.totalorder (!%p113_p2), %s771_s10, 1 }
   0x6   : > { %116 = sbr.rel (%p113_p2) target bundleno = 494 (0x1ee), region = 28 }
   0xb   : > { %v989_v0 = vld [vmem:[%s1097_s1] sm:$0xff]  ;;  %vm476_vm0 = vcmask 719872   ;;  %s1100_s10 = smov (!%p134_p3, %s771_s10), 1  ;;  %vm480_vm1 = vcmask 1043456  }
   0xc   : > { %v780_v1 = vcombine.high %v989_v0, %v989_v0  ;;  %s844_s13 = smul.u32 432, %s1100_s10  ;;  %v779_v62 = vcombine.low %v989_v0, %v989_v0  ;;  %s843_s17 = sshll.u32 %s1100_s10, 5 }
   0xd   : > { %s143_s20 = scalar_lea.vmem %s1098_s2, %s843_s17 }
   0xe   : > { %838 = vmatprep.mubr.msk.bf16.mxu0 %vm476_vm0, %v780_v1  ;;  %840 = vmatprep.mubr.msk.bf16.mxu1 %vm476_vm0, %v780_v1  ;;  %s999_s16 = scalar_lea.vmem %s1096_s0, %s844_s13 }
   0xf   : > { %v853_v2 = vld [vmem:[%s999_s16 + $0xe4] ss:$16 sps:$4 sm:$0xff]   ;;  %v855_v3 = vld [vmem:[%s999_s16 + $0xec] ss:$16 sps:$4 sm:$0xff]   ;;  %v857_v4 = vld [vmem:[%s999_s16 + $0xe0] ss:$16 sps:$4 sm:$0xff]  }
  0x10   : > { %493 = vmatprep.subr.bf16.mxu0 %v853_v2  ;;  %v858_v5 = vld [vmem:[%s999_s16 + $0xe8] ss:$16 sps:$4 sm:$0xff]   ;;  %534 = vmatprep.subr.bf16.mxu1 %v855_v3  ;;  %v859_v6 = vld [vmem:[%s999_s16 + $0xc4] ss:$16 sps:$4 sm:$0xff]   ;;  %v861_v7 = vld [vmem:[%s999_s16 + $0xcc] ss:$16 sps:$4 sm:$0xff]  }
  0x11   : > { %494 = vmatpush1.bf16.msra.mxu0 %v857_v4  ;;  %535 = vmatpush1.bf16.msra.mxu1 %v858_v5  ;;  %v863_v8 = vld [vmem:[%s999_s16 + $0xc0] ss:$16 sps:$4 sm:$0xff]   ;;  %v864_v9 = vld [vmem:[%s999_s16 + $0xc8] ss:$16 sps:$4 sm:$0xff]   ;;  %v865_v10 = vld [vmem:[%s999_s16 + $0xa4] ss:$16 sps:$4 sm:$0xff]  }
  0x12   : > { %495 = vmatprep.subr.bf16.mxu0 %v859_v6  ;;  %536 = vmatprep.subr.bf16.mxu1 %v861_v7  ;;  %v867_v11 = vld [vmem:[%s999_s16 + $0xac] ss:$16 sps:$4 sm:$0xff]   ;;  %v869_v12 = vld [vmem:[%s999_s16 + $0xa0] ss:$16 sps:$4 sm:$0xff]   ;;  %v870_v13 = vld [vmem:[%s999_s16 + $0xa8] ss:$16 sps:$4 sm:$0xff]  }
  0x13   : > { %v871_v14 = vld [vmem:[%s999_s16 + $0x84] ss:$16 sps:$4 sm:$0xff]   ;;  %v873_v15 = vld [vmem:[%s999_s16 + $0x8c] ss:$16 sps:$4 sm:$0xff]   ;;  %v875_v16 = vld [vmem:[%s999_s16 + $0x80] ss:$16 sps:$4 sm:$0xff]  }
  0x14   : > { %v876_v17 = vld [vmem:[%s999_s16 + $0x88] ss:$16 sps:$4 sm:$0xff]   ;;  %v877_v18 = vld [vmem:[%s999_s16 + $0x64] ss:$16 sps:$4 sm:$0xff]   ;;  %v879_v19 = vld [vmem:[%s999_s16 + $0x6c] ss:$16 sps:$4 sm:$0xff]  }
  0x15   : > { %496 = vmatpush1.bf16.msra.mxu0 %v863_v8  ;;  %537 = vmatpush1.bf16.msra.mxu1 %v864_v9  ;;  %v881_v20 = vld [vmem:[%s999_s16 + $0x60] ss:$16 sps:$4 sm:$0xff]   ;;  %v882_v21 = vld [vmem:[%s999_s16 + $0x68] ss:$16 sps:$4 sm:$0xff]   ;;  %v883_v22 = vld [vmem:[%s999_s16 + $0x44] ss:$16 sps:$4 sm:$0xff]  }
  0x16   : > { %497 = vmatprep.subr.bf16.mxu0 %v865_v10  ;;  %538 = vmatprep.subr.bf16.mxu1 %v867_v11  ;;  %v885_v23 = vld [vmem:[%s999_s16 + $0x4c] ss:$16 sps:$4 sm:$0xff]   ;;  %v887_v24 = vld [vmem:[%s999_s16 + $0x40] ss:$16 sps:$4 sm:$0xff]   ;;  %v888_v25 = vld [vmem:[%s999_s16 + $0x48] ss:$16 sps:$4 sm:$0xff]  }
  0x17   : > { %v889_v26 = vld [vmem:[%s999_s16 + $0x24] ss:$16 sps:$4 sm:$0xff]   ;;  %v891_v27 = vld [vmem:[%s999_s16 + $0x2c] ss:$16 sps:$4 sm:$0xff]   ;;  %v893_v28 = vld [vmem:[%s999_s16 + $0x20] ss:$16 sps:$4 sm:$0xff]  }
  0x18   : > { %v894_v29 = vld [vmem:[%s999_s16 + $0x28] ss:$16 sps:$4 sm:$0xff]   ;;  %v895_v30 = vld [vmem:[%s999_s16 + $0x4] ss:$16 sps:$4 sm:$0xff]   ;;  %v897_v31 = vld [vmem:[%s999_s16 + $0xc] ss:$16 sps:$4 sm:$0xff]  }
  0x19   : > { %498 = vmatpush1.bf16.msra.mxu0 %v869_v12  ;;  %539 = vmatpush1.bf16.msra.mxu1 %v870_v13  ;;  %v197_v32 = vld [vmem:[%s999_s16 + $0x1a0] sm:$0xff]  ;;  %v198_v33 = vld [vmem:[%s999_s16 + $0x1a8] sm:$0xff] }
  0x1a   : > { %499 = vmatprep.subr.bf16.mxu0 %v871_v14  ;;  %540 = vmatprep.subr.bf16.mxu1 %v873_v15  ;;  %v899_v34 = vld [vmem:[%s999_s16] ss:$16 sps:$4 sm:$0xff]   ;;  %v900_v35 = vld [vmem:[%s999_s16 + $0x8] ss:$16 sps:$4 sm:$0xff]   ;;  %v834_v36 = vcombine.high %v197_v32, %v197_v32  ;;  %v836_v37 = vcombine.high %v198_v33, %v198_v33  ;;  %v833_v38 = vcombine.low %v197_v32, %v197_v32  ;;  %v905_v40 = vld [vmem:[%s999_s16 + $0x184] ss:$16 sps:$4 sm:$0xff]  }
  0x1b   : > { %v835_v39 = vcombine.low %v198_v33, %v198_v33  ;;  %v907_v43 = vld [vmem:[%s999_s16 + $0x18c] ss:$16 sps:$4 sm:$0xff]   ;;  %v909_v44 = vld [vmem:[%s999_s16 + $0x180] ss:$16 sps:$4 sm:$0xff]   ;;  %v910_v45 = vld [vmem:[%s999_s16 + $0x188] ss:$16 sps:$4 sm:$0xff]  }
  0x1c   : > { %v482_v41 = vsel %vm480_vm1, %v833_v38, 0  ;;  %v911_v46 = vld [vmem:[%s999_s16 + $0x164] ss:$16 sps:$4 sm:$0xff]   ;;  %v913_v47 = vld [vmem:[%s999_s16 + $0x16c] ss:$16 sps:$4 sm:$0xff]  }
  0x1d   : > { %500 = vmatpush1.bf16.msra.mxu0 %v875_v16  ;;  %541 = vmatpush1.bf16.msra.mxu1 %v876_v17  ;;  %v488_v42 = vsel %vm480_vm1, %v835_v39, 0  ;;  %v915_v48 = vld [vmem:[%s999_s16 + $0x160] ss:$16 sps:$4 sm:$0xff]   ;;  %v916_v49 = vld [vmem:[%s999_s16 + $0x168] ss:$16 sps:$4 sm:$0xff]  }
  0x1e   : > { %501 = vmatprep.subr.bf16.mxu0 %v877_v18  ;;  %542 = vmatprep.subr.bf16.mxu1 %v879_v19  ;;  %v917_v50 = vld [vmem:[%s999_s16 + $0x144] ss:$16 sps:$4 sm:$0xff]   ;;  %v919_v51 = vld [vmem:[%s999_s16 + $0x14c] ss:$16 sps:$4 sm:$0xff]   ;;  %v921_v52 = vld [vmem:[%s999_s16 + $0x140] ss:$16 sps:$4 sm:$0xff]  }
  0x1f   : > { %v922_v53 = vld [vmem:[%s999_s16 + $0x148] ss:$16 sps:$4 sm:$0xff]   ;;  %v923_v54 = vld [vmem:[%s999_s16 + $0x124] ss:$16 sps:$4 sm:$0xff]   ;;  %v925_v55 = vld [vmem:[%s999_s16 + $0x12c] ss:$16 sps:$4 sm:$0xff]  }
  0x20   : > { %v927_v56 = vld [vmem:[%s999_s16 + $0x120] ss:$16 sps:$4 sm:$0xff]   ;;  %v928_v57 = vld [vmem:[%s999_s16 + $0x128] ss:$16 sps:$4 sm:$0xff]   ;;  %v929_v58 = vld [vmem:[%s999_s16 + $0x104] ss:$16 sps:$4 sm:$0xff]  }
  0x21   : > { %502 = vmatpush1.bf16.msra.mxu0 %v881_v20  ;;  %543 = vmatpush1.bf16.msra.mxu1 %v882_v21  ;;  %v931_v59 = vld [vmem:[%s999_s16 + $0x10c] ss:$16 sps:$4 sm:$0xff]   ;;  %v933_v60 = vld [vmem:[%s999_s16 + $0x100] ss:$16 sps:$4 sm:$0xff]   ;;  %v934_v61 = vld [vmem:[%s999_s16 + $0x108] ss:$16 sps:$4 sm:$0xff]  }
  0x22   : > { %503 = vmatprep.subr.bf16.mxu0 %v883_v22  ;;  %544 = vmatprep.subr.bf16.mxu1 %v885_v23 }
  0x25   : > { %504 = vmatpush1.bf16.msra.mxu0 %v887_v24  ;;  %545 = vmatpush1.bf16.msra.mxu1 %v888_v25 }
  0x26   : > { %505 = vmatprep.subr.bf16.mxu0 %v889_v26  ;;  %546 = vmatprep.subr.bf16.mxu1 %v891_v27 }
  0x29   : > { %506 = vmatpush1.bf16.msra.mxu0 %v893_v28  ;;  %547 = vmatpush1.bf16.msra.mxu1 %v894_v29 }
  0x2a   : > { %507 = vmatprep.subr.bf16.mxu0 %v895_v30  ;;  %548 = vmatprep.subr.bf16.mxu1 %v897_v31 }
  0x2d   : > { %508 = vmatpush1.bf16.msra.mxu0 %v899_v34  ;;  %549 = vmatpush1.bf16.msra.mxu1 %v900_v35 }
  0x2e   : > { %837 = vmatprep.subr.msk.bf16.mxu0 %vm480_vm1, %v834_v36  ;;  %839 = vmatprep.subr.msk.bf16.mxu1 %vm480_vm1, %v836_v37 }
  0x31   : > { %514 = vmatpush2.bf16.msra.mxu0 %v482_v41  ;;  %555 = vmatpush2.bf16.msra.mxu1 %v488_v42 }
  0x32   : > { %515 = vmatprep.subr.bf16.mxu0 %v905_v40  ;;  %556 = vmatprep.subr.bf16.mxu1 %v907_v43 }
  0x35   : > { %516 = vmatpush2.bf16.msra.mxu0 %v909_v44  ;;  %557 = vmatpush2.bf16.msra.mxu1 %v910_v45 }
  0x36   : > { %517 = vmatprep.subr.bf16.mxu0 %v911_v46  ;;  %558 = vmatprep.subr.bf16.mxu1 %v913_v47 }
  0x39   : > { %518 = vmatpush2.bf16.msra.mxu0 %v915_v48  ;;  %559 = vmatpush2.bf16.msra.mxu1 %v916_v49 }
  0x3a   : > { %519 = vmatprep.subr.bf16.mxu0 %v917_v50  ;;  %560 = vmatprep.subr.bf16.mxu1 %v919_v51 }
  0x3d   : > { %520 = vmatpush2.bf16.msra.mxu0 %v921_v52  ;;  %561 = vmatpush2.bf16.msra.mxu1 %v922_v53 }
  0x3e   : > { %521 = vmatprep.subr.bf16.mxu0 %v923_v54  ;;  %562 = vmatprep.subr.bf16.mxu1 %v925_v55 }
  0x41   : > { %522 = vmatpush2.bf16.msra.mxu0 %v927_v56  ;;  %563 = vmatpush2.bf16.msra.mxu1 %v928_v57 }
  0x42   : > { %523 = vmatprep.subr.bf16.mxu0 %v929_v58  ;;  %564 = vmatprep.subr.bf16.mxu1 %v931_v59 }
  0x45   : > { %524 = vmatpush2.bf16.msra.mxu0 %v933_v60  ;;  %565 = vmatpush2.bf16.msra.mxu1 %v934_v61 }
  0x48   : > { %526 = vmatmul.mubr.bf16.vlgmr.msra.gmra.mxu0 %v779_v62  ;;  %567 = vmatmul.mubr.bf16.vlgmr.msra.gmra.mxu1 %v779_v62 }
 0x108   : > { %v527_v63 = vpop.f32.mrf.mxu0  ;;  %v568_v1 = vpop.f32.mrf.mxu1 }
 0x109   : > { %v580_v4 = vmul.f32 %v527_v63, %v527_v63  ;;  %v582_v5 = vmul.f32 %v568_v1, %v568_v1 }
 0x10a   : > { %v529_v2 = vpop.f32.mrf.mxu0  ;;  %v570_v3 = vpop.f32.mrf.mxu1 }
 0x10b   : > { %v575_v6 = vadd.f32 %v529_v2, %v527_v63  ;;  %v581_v7 = vmul.f32 %v529_v2, %v529_v2  ;;  %v583_v15 = vmul.f32 %v570_v3, %v570_v3 }
 0x10c   : > { %v531_v8 = vpop.f32.mrf.mxu0  ;;  %v572_v9 = vpop.f32.mrf.mxu1 }
 0x10d   : > { %v576_v10 = vadd.f32 %v575_v6, %v568_v1  ;;  %v584_v11 = vadd.f32 %v581_v7, %v580_v4 }
 0x10e   : > { %v532_v12 = vpop.f32.mrf.mxu0  ;;  %v573_v13 = vpop.f32.mrf.mxu1 }
 0x10f   : > { %v577_v14 = vadd.f32 %v576_v10, %v570_v3  ;;  %v585_v0 = vadd.f32 %v584_v11, %v582_v5 }
 0x111   : > { %578 = vadd.xlane.f32.xlu0 %v577_v14  ;;  %v586_v16 = vadd.f32 %v585_v0, %v583_v15 }
 0x115   : > { %587 = vadd.xlane.f32.xlu0 %v586_v16 }
 0x19a   : > { %v579_v17 = vpop.xlane.xlu0 %578 }
 0x19b   : > { %v589_v18 = vmul.f32 0.001953125, %v579_v17 }
 0x19d   : > { %v591_v20 = vmul.f32 %v589_v18, %v589_v18  ;;  %v594_v25 = vsub.f32 %v527_v63, %v589_v18  ;;  %v595_v26 = vsub.f32 %v529_v2, %v589_v18  ;;  %v596_v27 = vsub.f32 %v568_v1, %v589_v18 }
 0x19e   : > { %v588_v19 = vpop.xlane.xlu0 %587  ;;  %v597_v28 = vsub.f32 %v570_v3, %v589_v18 }
 0x19f   : > { %v590_v21 = vmul.f32 0.001953125, %v588_v19 }
 0x1a1   : > { %v592_v22 = vsub.f32 %v590_v21, %v591_v20 }
 0x1a3   : > { %v593_v23 = vmax.f32 %v592_v22, 0.0 }
 0x1a5   : > { %v598_v24 = vadd.f32 1e-05, %v593_v23 }
 0x1a7   : > { %937 = vrsqrt.f32 %v598_v24 }
 0x1b4   : > { %v938_v29 = vpop.eup %937 }
 0x1b5   : > { %v1057_v30 = vmul.f32 %v938_v29, %v594_v25  ;;  %v1059_v31 = vmul.f32 %v938_v29, %v595_v26  ;;  %v1061_v32 = vmul.f32 %v938_v29, %v596_v27  ;;  %v1063_v33 = vmul.f32 %v938_v29, %v597_v28 }
 0x1b7   : > { %v1066_v34 = vmul.f32 0.70710677, %v1057_v30  ;;  %v1069_v35 = vmul.f32 0.70710677, %v1059_v31  ;;  %v1072_v36 = vmul.f32 0.70710677, %v1061_v32 }
 0x1b8   : > { %v1075_v37 = vmul.f32 0.70710677, %v1063_v33 }
 0x1b9   : > { %v612_v38 = vand.u32 2147483647, %v1066_v34  ;;  %v613_v39 = vand.u32 2147483647, %v1069_v35  ;;  %v614_v40 = vand.u32 2147483647, %v1072_v36 }
 0x1ba   : > { %v615_v41 = vand.u32 2147483647, %v1075_v37  ;;  %vm692_vm2 = vcmp.lt.f32.partialorder %v1066_v34, 0.0  ;;  %vm693_vm3 = vcmp.lt.f32.partialorder %v1069_v35, 0.0  ;;  %vm694_vm4 = vcmp.lt.f32.partialorder %v1072_v36, 0.0 }
 0x1bb   : > { %v616_v42 = vmul.f32 0.3275911, %v612_v38  ;;  %v617_v43 = vmul.f32 0.3275911, %v613_v39  ;;  %v618_v44 = vmul.f32 0.3275911, %v614_v40  ;;  %v668_v50 = vmul.f32 %v612_v38, %v612_v38 }
 0x1bc   : > { %v619_v45 = vmul.f32 0.3275911, %v615_v41  ;;  %v669_v51 = vmul.f32 %v613_v39, %v613_v39  ;;  %v670_v52 = vmul.f32 %v614_v40, %v614_v40  ;;  %v671_v53 = vmul.f32 %v615_v41, %v615_v41 }
 0x1bd   : > { %v620_v46 = vadd.f32 1.0, %v616_v42  ;;  %v621_v47 = vadd.f32 1.0, %v617_v43  ;;  %v622_v48 = vadd.f32 1.0, %v618_v44  ;;  %v672_v54 = vsub.f32 0.0, %v668_v50 }
 0x1be   : > { %v623_v49 = vadd.f32 1.0, %v619_v45  ;;  %v673_v55 = vsub.f32 0.0, %v669_v51  ;;  %v674_v56 = vsub.f32 0.0, %v670_v52  ;;  %v675_v58 = vsub.f32 0.0, %v671_v53 }
 0x1bf   : > { %939 = vrcp.f32 %v620_v46  ;;  %v676_v61 = vmul.f32 1.442695, %v672_v54  ;;  %vm695_vm5 = vcmp.lt.f32.partialorder %v1075_v37, 0.0  ;;  %v607_v36 = vmul.f32 0.5, %v1063_v33 }
 0x1c0   : > { %941 = vrcp.f32 %v621_v47  ;;  %v678_v1 = vmul.f32 1.442695, %v673_v55  ;;  %v680_v5 = vmul.f32 1.442695, %v674_v56  ;;  %v682_v8 = vmul.f32 1.442695, %v675_v58 }
 0x1c1   : > { %943 = vrcp.f32 %v622_v48 }
 0x1c2   : > { %945 = vrcp.f32 %v623_v49 }
 0x1c3   : > { %947 = vpow2.f32 %v676_v61 }
 0x1c4   : > { %949 = vpow2.f32 %v678_v1 }
 0x1c5   : > { %951 = vpow2.f32 %v680_v5 }
 0x1c6   : > { %953 = vpow2.f32 %v682_v8 }
 0x1cc   : > { %v940_v57 = vpop.eup %939 }
 0x1cd   : > { %v942_v59 = vpop.eup %941  ;;  %v632_v60 = vmul.f32 1.0614054, %v940_v57 }
 0x1ce   : > { %v944_v62 = vpop.eup %943  ;;  %v633_v63 = vmul.f32 1.0614054, %v942_v59 }
 0x1cf   : > { %v946_v2 = vpop.eup %945  ;;  %v634_v3 = vmul.f32 1.0614054, %v944_v62  ;;  %v636_v4 = vadd.f32 -1.4531521, %v632_v60 }
 0x1d0   : > { %v635_v6 = vmul.f32 1.0614054, %v946_v2  ;;  %v637_v7 = vadd.f32 -1.4531521, %v633_v63  ;;  %v948_v42 = vpop.eup %947 }
 0x1d1   : > { %v638_v9 = vadd.f32 -1.4531521, %v634_v3  ;;  %v640_v10 = vmul.f32 %v940_v57, %v636_v4  ;;  %v950_v45 = vpop.eup %949  ;;  %v605_v3 = vmul.f32 0.5, %v1059_v31 }
 0x1d2   : > { %v639_v11 = vadd.f32 -1.4531521, %v635_v6  ;;  %v641_v12 = vmul.f32 %v942_v59, %v637_v7  ;;  %v952_v48 = vpop.eup %951 }
 0x1d3   : > { %v642_v13 = vmul.f32 %v944_v62, %v638_v9  ;;  %v644_v14 = vadd.f32 1.4214138, %v640_v10  ;;  %v954_v51 = vpop.eup %953 }
 0x1d4   : > { %v643_v0 = vmul.f32 %v946_v2, %v639_v11  ;;  %v645_v15 = vadd.f32 1.4214138, %v641_v12 }
 0x1d5   : > { %v646_v16 = vadd.f32 1.4214138, %v642_v13  ;;  %v648_v17 = vmul.f32 %v940_v57, %v644_v14 }
 0x1d6   : > { %v647_v18 = vadd.f32 1.4214138, %v643_v0  ;;  %v649_v19 = vmul.f32 %v942_v59, %v645_v15 }
 0x1d7   : > { %v650_v20 = vmul.f32 %v944_v62, %v646_v16  ;;  %v652_v21 = vadd.f32 -0.28449672, %v648_v17 }
 0x1d8   : > { %v651_v22 = vmul.f32 %v946_v2, %v647_v18  ;;  %v653_v23 = vadd.f32 -0.28449672, %v649_v19 }
 0x1d9   : > { %v654_v24 = vadd.f32 -0.28449672, %v650_v20  ;;  %v656_v25 = vmul.f32 %v940_v57, %v652_v21 }
 0x1da   : > { %v655_v26 = vadd.f32 -0.28449672, %v651_v22  ;;  %v657_v27 = vmul.f32 %v942_v59, %v653_v23 }
 0x1db   : > { %v658_v28 = vmul.f32 %v944_v62, %v654_v24  ;;  %v660_v29 = vadd.f32 0.2548296, %v656_v25 }
 0x1dc   : > { %v659_v38 = vmul.f32 %v946_v2, %v655_v26  ;;  %v661_v39 = vadd.f32 0.2548296, %v657_v27 }
 0x1dd   : > { %v662_v40 = vadd.f32 0.2548296, %v658_v28  ;;  %v664_v41 = vmul.f32 %v940_v57, %v660_v29 }
 0x1de   : > { %v663_v43 = vadd.f32 0.2548296, %v659_v38  ;;  %v665_v44 = vmul.f32 %v942_v59, %v661_v39  ;;  %v604_v59 = vmul.f32 0.5, %v1057_v30  ;;  %v606_v30 = vmul.f32 0.5, %v1061_v32 }
 0x1df   : > { %v666_v46 = vmul.f32 %v944_v62, %v662_v40  ;;  %v684_v47 = vmul.f32 %v948_v42, %v664_v41 }
 0x1e0   : > { %v667_v49 = vmul.f32 %v946_v2, %v663_v43  ;;  %v685_v50 = vmul.f32 %v950_v45, %v665_v44 }
 0x1e1   : > { %v686_v52 = vmul.f32 %v952_v48, %v666_v46  ;;  %v688_v53 = vsub.f32 1.0, %v684_v47 }
 0x1e2   : > { %v687_v54 = vmul.f32 %v954_v51, %v667_v49  ;;  %v689_v55 = vsub.f32 1.0, %v685_v50 }
 0x1e3   : > { %v690_v56 = vsub.f32 1.0, %v686_v52  ;;  %v696_v58 = vsub.f32 0.0, %v688_v53 }
 0x1e4   : > { %v691_v60 = vsub.f32 1.0, %v687_v54  ;;  %v697_v57 = vsub.f32 0.0, %v689_v55 }
 0x1e5   : > { %v698_v61 = vsub.f32 0.0, %v690_v56  ;;  %v700_v62 = vsel %vm692_vm2, %v696_v58, %v688_v53 }
 0x1e6   : > { %v699_v63 = vsub.f32 0.0, %v691_v60  ;;  %v701_v1 = vsel %vm693_vm3, %v697_v57, %v689_v55  ;;  %v704_v2 = vadd.f32 1.0, %v700_v62 }
 0x1e7   : > { %v702_v34 = vsel %vm694_vm4, %v698_v61, %v690_v56  ;;  %v705_v4 = vadd.f32 1.0, %v701_v1 }
 0x1e8   : > { %v703_v35 = vsel %vm695_vm5, %v699_v63, %v691_v60  ;;  %v706_v5 = vadd.f32 1.0, %v702_v34  ;;  %v708_v6 = vmul.f32 %v704_v2, %v604_v59 }
 0x1e9   : > { %v707_v7 = vadd.f32 1.0, %v703_v35  ;;  %v709_v8 = vmul.f32 %v705_v4, %v605_v3 }
 0x1ea   : > { %v710_v9 = vmul.f32 %v706_v5, %v606_v30  ;;  %712 = vst [vmem:[%s143_s20] sm:$0xff] %v708_v6 }
 0x1eb   : > { %v711_v10 = vmul.f32 %v707_v7, %v607_v36  ;;  %713 = vst [vmem:[%s143_s20 + $0x8] sm:$0xff] %v709_v8 }
 0x1ec   : > { %714 = vst [vmem:[%s143_s20 + $0x10] sm:$0xff] %v710_v9 }
 0x1ed   : > { %715 = vst [vmem:[%s143_s20 + $0x18] sm:$0xff] %v711_v10 }
 0x1ee PF: > { %s12_s9 = sadd.s32 1, %s961_s9  }
 0x1ef   : > { %p9_p4 = scmp.ge.s32.totalorder %s12_s9, 4  }
 0x1f1   :  { %11 = sbr.rel (!%p9_p4) target bundleno = 1 (0x1), region = 58 }

// kernel: down_block_forward.10
= control target key start
LH: loop header
LB: loop body
LE: loop exit
PB: predicated region body
PF: predicated region fallthrough
CT: control target
= control target key end

     0   :  { %s746_s12 = smov 0   ;;  %s841_s0 = inlined_call_operand.vmem [shape: f32[2,8,320], index: 0, kind: input, shape index: {}]   ;;  %s842_s1 = inlined_call_operand.vmem [shape: bf16[8,8], index: 1, kind: input, shape index: {}]   ;;  %s843_s2 = inlined_call_operand.vmem [shape: bf16[8,8], index: 2, kind: input, shape index: {}]   ;;  %s844_s3 = inlined_call_operand.vmem [shape: f32[2,8,320], index: 3, kind: output, shape index: {}]  }
   0x1 LB: > { %s644_s13 = sadd.s32 4294967295, %s721_s12   ;;  %p648_p0 = scmp.ge.s32.totalorder %s721_s12, 1  ;;  %s721_s12 = sphi %s746_s12, %s13_s12  }
   0x2   : > { %p137_p1 = scmp.lt.s32.totalorder %s721_s12, 3 }
   0x4   : > { %p138_p2 = pnand %p648_p0, %p137_p1 }
   0x5   : > { %p161_p3 = scmp.lt.s32.totalorder (!%p138_p2), %s644_s13, 1 }
   0x6   : > { %141 = sbr.rel (%p138_p2) target bundleno = 864 (0x360), region = 32 }
   0xb   : > { %v723_v0 = vmov 0.0   ;;  %v724_v1 = vmov 0   ;;  %s846_s13 = smov (!%p161_p3, %s644_s13), 1  ;;  %vm725_vm0 = vmmov 0   ;;  %vm183_vm1 = vcmask 1043456  }
   0xc   : > { %663 = vmatprep.subr.bf16.mxu1 %v723_v0  ;;  %225 = vmatprep.mubr.bf16.mxu0 %v724_v1  ;;  %s675_s14 = smul.u32 24, %s846_s13  ;;  %v178_v10 = vld [vmem:[%s842_s1] sm:$0xf]  ;;  %vm179_vm2 = vcmask 64512   ;;  %vm275_vm3 = vcmask 523264  }
   0xd   : > { %665 = vmatprep.mubr.msk.bf16.mxu1 %vm725_vm0, %v723_v0 }
   0xe   : > { %s165_s17 = scalar_lea.vmem %s841_s0, %s675_s14  ;;  %s170_s24 = scalar_lea.vmem %s844_s3, %s675_s14 }
   0xf   : > { %v173_v2 = vld [vmem:[%s165_s17 + $0x8] sm:$0xff]  ;;  %v172_v3 = vld [vmem:[%s165_s17] sm:$0xff]  ;;  %v174_v4 = vld [vmem:[%s165_s17 + $0x10] sm:$0xff] }
  0x10   : > { %v176_v5 = vpack.c.bf16 %v173_v2, %v173_v2  ;;  %v175_v6 = vpack.c.bf16 %v172_v3, %v172_v3  ;;  %v177_v7 = vpack.c.bf16 %v174_v4, %v174_v4 }
  0x12   : > { %651 = vmatprep.subr.msk.bf16.mxu0 %vm183_vm1, %v176_v5  ;;  %v185_v8 = vsel %vm183_vm1, %v175_v6, 0  ;;  %v191_v9 = vsel %vm183_vm1, %v177_v7, 0 }
  0x13   : > { %208 = vmatpush1.bf16.msra.mxu0 %v185_v8  ;;  %664 = vmatpush3.bf16.msra.mxu1 %v191_v9 }
  0x14   : > { %669 = vmatprep.subr.bf16.mxu1 %v723_v0 }
  0x16   : > { %652 = vmatmul.mubr.msk.bf16.vlgmr.msra.gmra.mxu0 %vm179_vm2, %v178_v10  ;;  %666 = vmatmul.mubr.msk.bf16.vlgmr.msra.gmra.mxu1 %vm179_vm2, %v178_v10 }
  0x17   : > { %430 = vmatprep.mubr.bf16.mxu0 %v724_v1  ;;  %671 = vmatprep.mubr.msk.bf16.mxu1 %vm725_vm0, %v723_v0 }
  0xd6   : > { %v227_v11 = vpop.f32.mrf.mxu0  ;;  %v268_v12 = vpop.f32.mrf.mxu1 }
  0xd7   : > { %v282_v13 = vmul.f32 %v268_v12, %v268_v12  ;;  %v276_v16 = vsel %vm275_vm3, %v268_v12, 0.0  ;;  %v280_v17 = vmul.f32 %v227_v11, %v227_v11 }
  0xd8   : > { %v229_v14 = vpop.f32.mrf.mxu0  ;;  %v667_v15 = vpop.f32.mrf.mxu1 }
  0xd9   : > { %v281_v18 = vmul.f32 %v229_v14, %v229_v14  ;;  %v274_v19 = vadd.f32 %v229_v14, %v227_v11  ;;  %v284_v26 = vsel %vm275_vm3, %v282_v13, 0.0 }
  0xda   : > { %v231_v20 = vpop.f32.mrf.mxu0  ;;  %v271_v21 = vpop.f32.mrf.mxu1 }
  0xdb   : > { %v277_v22 = vadd.f32 %v276_v16, %v274_v19  ;;  %v283_v23 = vadd.f32 %v281_v18, %v280_v17 }
  0xdc   : > { %v232_v24 = vpop.f32.mrf.mxu0  ;;  %v668_v25 = vpop.f32.mrf.mxu1 }
  0xdd   : > { %278 = vadd.xlane.f32.xlu0 %v277_v22  ;;  %v285_v27 = vadd.f32 %v284_v26, %v283_v23 }
  0xe1   : > { %286 = vadd.xlane.f32.xlu0 %v285_v27 }
 0x166   : > { %v279_v28 = vpop.xlane.xlu0 %278 }
 0x167   : > { %v288_v29 = vmul.f32 0.003125, %v279_v28 }
 0x169   : > { %v290_v31 = vmul.f32 %v288_v29, %v288_v29  ;;  %v293_v36 = vsub.f32 %v227_v11, %v288_v29  ;;  %v294_v37 = vsub.f32 %v229_v14, %v288_v29  ;;  %v295_v38 = vsub.f32 %v268_v12, %v288_v29 }
 0x16a   : > { %v287_v30 = vpop.xlane.xlu0 %286 }
 0x16b   : > { %v289_v32 = vmul.f32 0.003125, %v287_v30 }
 0x16d   : > { %v291_v33 = vsub.f32 %v289_v32, %v290_v31 }
 0x16f   : > { %v292_v34 = vmax.f32 %v291_v33, 0.0 }
 0x171   : > { %v296_v35 = vadd.f32 1e-05, %v292_v34 }
 0x173   : > { %687 = vrsqrt.f32 %v296_v35 }
 0x180   : > { %v688_v39 = vpop.eup %687 }
 0x181   : > { %v774_v40 = vmul.f32 %v688_v39, %v294_v37  ;;  %v776_v41 = vmul.f32 %v688_v39, %v293_v36  ;;  %v778_v42 = vmul.f32 %v688_v39, %v295_v38 }
 0x183   : > { %v781_v43 = vmul.f32 0.70710677, %v774_v40  ;;  %v784_v44 = vmul.f32 0.70710677, %v776_v41  ;;  %v787_v45 = vmul.f32 0.70710677, %v778_v42 }
 0x185   : > { %v308_v46 = vand.u32 2147483647, %v781_v43  ;;  %v307_v47 = vand.u32 2147483647, %v784_v44  ;;  %v309_v48 = vand.u32 2147483647, %v787_v45 }
 0x186   : > { %vm368_vm4 = vcmp.lt.f32.partialorder %v781_v43, 0.0  ;;  %vm367_vm5 = vcmp.lt.f32.partialorder %v784_v44, 0.0  ;;  %vm369_vm6 = vcmp.lt.f32.partialorder %v787_v45, 0.0  ;;  %v303_v43 = vmul.f32 0.5, %v778_v42 }
 0x187   : > { %v311_v49 = vmul.f32 0.3275911, %v308_v46  ;;  %v310_v50 = vmul.f32 0.3275911, %v307_v47  ;;  %v312_v51 = vmul.f32 0.3275911, %v309_v48  ;;  %v350_v55 = vmul.f32 %v308_v46, %v308_v46 }
 0x188   : > { %v349_v56 = vmul.f32 %v307_v47, %v307_v47  ;;  %v351_v58 = vmul.f32 %v309_v48, %v309_v48  ;;  %v302_v48 = vmul.f32 0.5, %v774_v40 }
 0x189   : > { %v314_v52 = vadd.f32 1.0, %v311_v49  ;;  %v313_v53 = vadd.f32 1.0, %v310_v50  ;;  %v315_v54 = vadd.f32 1.0, %v312_v51  ;;  %v353_v57 = vsub.f32 0.0, %v350_v55 }
 0x18a   : > { %v352_v59 = vsub.f32 0.0, %v349_v56  ;;  %v354_v0 = vsub.f32 0.0, %v351_v58  ;;  %v301_v51 = vmul.f32 0.5, %v776_v41  ;;  %v382_v41 = vld [vmem:[%s843_s2] sm:$0xf] }
 0x18b   : > { %689 = vrcp.f32 %v314_v52  ;;  %v357_v63 = vmul.f32 1.442695, %v353_v57 }
 0x18c   : > { %691 = vrcp.f32 %v313_v53  ;;  %v355_v2 = vmul.f32 1.442695, %v352_v59  ;;  %v359_v8 = vmul.f32 1.442695, %v354_v0 }
 0x18d   : > { %693 = vrcp.f32 %v315_v54 }
 0x18e   : > { %695 = vpow2.f32 %v357_v63 }
 0x18f   : > { %697 = vpow2.f32 %v355_v2 }
 0x190   : > { %699 = vpow2.f32 %v359_v8 }
 0x198   : > { %v690_v60 = vpop.eup %689 }
 0x199   : > { %v692_v61 = vpop.eup %691  ;;  %v323_v62 = vmul.f32 1.0614054, %v690_v60 }
 0x19a   : > { %v322_v1 = vmul.f32 1.0614054, %v692_v61  ;;  %v694_v4 = vpop.eup %693 }
 0x19b   : > { %v326_v3 = vadd.f32 -1.4531521, %v323_v62  ;;  %v324_v7 = vmul.f32 1.0614054, %v694_v4  ;;  %v696_v27 = vpop.eup %695 }
 0x19c   : > { %v325_v5 = vadd.f32 -1.4531521, %v322_v1  ;;  %v698_v29 = vpop.eup %697 }
 0x19d   : > { %v329_v6 = vmul.f32 %v690_v60, %v326_v3  ;;  %v327_v11 = vadd.f32 -1.4531521, %v324_v7  ;;  %v700_v35 = vpop.eup %699 }
 0x19e   : > { %v328_v9 = vmul.f32 %v692_v61, %v325_v5 }
 0x19f   : > { %v332_v10 = vadd.f32 1.4214138, %v329_v6  ;;  %v330_v14 = vmul.f32 %v694_v4, %v327_v11 }
 0x1a0   : > { %v331_v12 = vadd.f32 1.4214138, %v328_v9 }
 0x1a1   : > { %v335_v13 = vmul.f32 %v690_v60, %v332_v10  ;;  %v333_v17 = vadd.f32 1.4214138, %v330_v14 }
 0x1a2   : > { %v334_v15 = vmul.f32 %v692_v61, %v331_v12 }
 0x1a3   : > { %v338_v16 = vadd.f32 -0.28449672, %v335_v13  ;;  %v336_v20 = vmul.f32 %v694_v4, %v333_v17 }
 0x1a4   : > { %v337_v18 = vadd.f32 -0.28449672, %v334_v15 }
 0x1a5   : > { %v341_v19 = vmul.f32 %v690_v60, %v338_v16  ;;  %v339_v23 = vadd.f32 -0.28449672, %v336_v20 }
 0x1a6   : > { %v340_v21 = vmul.f32 %v692_v61, %v337_v18 }
 0x1a7   : > { %v344_v22 = vadd.f32 0.2548296, %v341_v19  ;;  %v342_v26 = vmul.f32 %v694_v4, %v339_v23 }
 0x1a8   : > { %v343_v24 = vadd.f32 0.2548296, %v340_v21 }
 0x1a9   : > { %v347_v25 = vmul.f32 %v690_v60, %v344_v22  ;;  %v345_v31 = vadd.f32 0.2548296, %v342_v26 }
 0x1aa   : > { %v346_v28 = vmul.f32 %v692_v61, %v343_v24 }
 0x1ab   : > { %v362_v30 = vmul.f32 %v696_v27, %v347_v25  ;;  %v348_v34 = vmul.f32 %v694_v4, %v345_v31 }
 0x1ac   : > { %v361_v32 = vmul.f32 %v698_v29, %v346_v28 }
 0x1ad   : > { %v365_v33 = vsub.f32 1.0, %v362_v30  ;;  %v363_v38 = vmul.f32 %v700_v35, %v348_v34 }
 0x1ae   : > { %v364_v36 = vsub.f32 1.0, %v361_v32 }
 0x1af   : > { %v371_v37 = vsub.f32 0.0, %v365_v33  ;;  %v366_v47 = vsub.f32 1.0, %v363_v38 }
 0x1b0   : > { %v370_v39 = vsub.f32 0.0, %v364_v36 }
 0x1b1   : > { %v374_v46 = vsel %vm368_vm4, %v371_v37, %v365_v33  ;;  %v372_v53 = vsub.f32 0.0, %v366_v47 }
 0x1b2   : > { %v377_v49 = vadd.f32 1.0, %v374_v46  ;;  %v373_v50 = vsel %vm367_vm5, %v370_v39, %v364_v36 }
 0x1b3   : > { %v376_v52 = vadd.f32 1.0, %v373_v50  ;;  %v375_v56 = vsel %vm369_vm6, %v372_v53, %v366_v47 }
 0x1b4   : > { %v380_v54 = vmul.f32 %v377_v49, %v302_v48  ;;  %v378_v58 = vadd.f32 1.0, %v375_v56 }
 0x1b5   : > { %v379_v55 = vmul.f32 %v376_v52, %v301_v51 }
 0x1b6   : > { %v384_v57 = vpack.c.bf16 %v380_v54, %v380_v54  ;;  %v381_v44 = vmul.f32 %v378_v58, %v303_v43 }
 0x1b7   : > { %v383_v59 = vpack.c.bf16 %v379_v55, %v379_v55 }
 0x1b8   : > { %654 = vmatprep.subr.msk.bf16.mxu0 %vm183_vm1, %v384_v57  ;;  %v385_v60 = vpack.c.bf16 %v381_v44, %v381_v44 }
 0x1b9   : > { %v390_v40 = vsel %vm183_vm1, %v383_v59, 0 }
 0x1ba   : > { %413 = vmatpush1.bf16.msra.mxu0 %v390_v40  ;;  %v396_v45 = vsel %vm183_vm1, %v385_v60, 0 }
 0x1bb   : > { %670 = vmatpush3.bf16.msra.mxu1 %v396_v45 }
 0x1bd   : > { %655 = vmatmul.mubr.msk.bf16.vlgmr.msra.gmra.mxu0 %vm179_vm2, %v382_v41 }
 0x1be   : > { %672 = vmatmul.mubr.msk.bf16.vlgmr.msra.gmra.mxu1 %vm179_vm2, %v382_v41 }
 0x27d   : > { %v432_v42 = vpop.f32.mrf.mxu0 }
 0x27e   : > { %v484_v62 = vmul.f32 %v432_v42, %v432_v42  ;;  %v473_v0 = vpop.f32.mrf.mxu1 }
 0x27f   : > { %v434_v61 = vpop.f32.mrf.mxu0  ;;  %v486_v2 = vmul.f32 %v473_v0, %v473_v0  ;;  %v480_v4 = vsel %vm275_vm3, %v473_v0, 0.0 }
 0x280   : > { %v485_v63 = vmul.f32 %v434_v61, %v434_v61  ;;  %v479_v1 = vadd.f32 %v434_v61, %v432_v42  ;;  %v673_v5 = vpop.f32.mrf.mxu1 }
 0x281   : > { %v436_v3 = vpop.f32.mrf.mxu0  ;;  %v488_v9 = vsel %vm275_vm3, %v486_v2, 0.0 }
 0x282   : > { %v481_v6 = vadd.f32 %v480_v4, %v479_v1  ;;  %v487_v7 = vadd.f32 %v485_v63, %v484_v62  ;;  %v476_v10 = vpop.f32.mrf.mxu1 }
 0x283   : > { %v437_v8 = vpop.f32.mrf.mxu0 }
 0x284   : > { %482 = vadd.xlane.f32.xlu1 %v481_v6  ;;  %v674_v11 = vpop.f32.mrf.mxu1  ;;  %v489_v12 = vadd.f32 %v488_v9, %v487_v7 }
 0x288   : > { %490 = vadd.xlane.f32.xlu1 %v489_v12 }
 0x30d   : > { %v483_v13 = vpop.xlane.xlu1 %482 }
 0x30e   : > { %v492_v14 = vmul.f32 0.003125, %v483_v13 }
 0x310   : > { %v494_v16 = vmul.f32 %v492_v14, %v492_v14  ;;  %v497_v21 = vsub.f32 %v432_v42, %v492_v14  ;;  %v498_v22 = vsub.f32 %v434_v61, %v492_v14  ;;  %v499_v23 = vsub.f32 %v473_v0, %v492_v14 }
 0x311   : > { %v491_v15 = vpop.xlane.xlu1 %490 }
 0x312   : > { %v493_v17 = vmul.f32 0.003125, %v491_v15 }
 0x314   : > { %v495_v18 = vsub.f32 %v493_v17, %v494_v16 }
 0x316   : > { %v496_v19 = vmax.f32 %v495_v18, 0.0 }
 0x318   : > { %v500_v20 = vadd.f32 1e-05, %v496_v19 }
 0x31a   : > { %701 = vrsqrt.f32 %v500_v20 }
 0x327   : > { %v702_v24 = vpop.eup %701 }
 0x328   : > { %v808_v25 = vmul.f32 %v702_v24, %v497_v21  ;;  %v810_v26 = vmul.f32 %v702_v24, %v498_v22  ;;  %v812_v27 = vmul.f32 %v702_v24, %v499_v23 }
 0x32a   : > { %v815_v28 = vmul.f32 0.70710677, %v808_v25  ;;  %v818_v29 = vmul.f32 0.70710677, %v810_v26  ;;  %v821_v30 = vmul.f32 0.70710677, %v812_v27 }
 0x32c   : > { %v511_v31 = vand.u32 2147483647, %v815_v28  ;;  %v512_v32 = vand.u32 2147483647, %v818_v29  ;;  %v513_v33 = vand.u32 2147483647, %v821_v30 }
 0x32d   : > { %vm571_vm7 = vcmp.lt.f32.partialorder %v815_v28, 0.0  ;;  %vm572_vm8 = vcmp.lt.f32.partialorder %v818_v29, 0.0  ;;  %vm573_vm9 = vcmp.lt.f32.partialorder %v821_v30, 0.0 }
 0x32e   : > { %v514_v34 = vmul.f32 0.3275911, %v511_v31  ;;  %v515_v35 = vmul.f32 0.3275911, %v512_v32  ;;  %v516_v36 = vmul.f32 0.3275911, %v513_v33  ;;  %v553_v46 = vmul.f32 %v511_v31, %v511_v31 }
 0x32f   : > { %v554_v47 = vmul.f32 %v512_v32, %v512_v32  ;;  %v555_v48 = vmul.f32 %v513_v33, %v513_v33 }
 0x330   : > { %v517_v37 = vadd.f32 1.0, %v514_v34  ;;  %v518_v38 = vadd.f32 1.0, %v515_v35  ;;  %v519_v39 = vadd.f32 1.0, %v516_v36  ;;  %v556_v49 = vsub.f32 0.0, %v553_v46 }
 0x331   : > { %v557_v50 = vsub.f32 0.0, %v554_v47  ;;  %v558_v51 = vsub.f32 0.0, %v555_v48  ;;  %v505_v34 = vmul.f32 0.5, %v808_v25 }
 0x332   : > { %703 = vrcp.f32 %v517_v37  ;;  %v559_v55 = vmul.f32 1.442695, %v556_v49  ;;  %v506_v37 = vmul.f32 0.5, %v810_v26 }
 0x333   : > { %705 = vrcp.f32 %v518_v38  ;;  %v561_v43 = vmul.f32 1.442695, %v557_v50  ;;  %v563_v44 = vmul.f32 1.442695, %v558_v51 }
 0x334   : > { %707 = vrcp.f32 %v519_v39  ;;  %v507_v39 = vmul.f32 0.5, %v812_v27 }
 0x335   : > { %709 = vpow2.f32 %v559_v55 }
 0x336   : > { %711 = vpow2.f32 %v561_v43 }
 0x337   : > { %713 = vpow2.f32 %v563_v44 }
 0x33f   : > { %v704_v52 = vpop.eup %703 }
 0x340   : > { %v706_v53 = vpop.eup %705  ;;  %v526_v54 = vmul.f32 1.0614054, %v704_v52 }
 0x341   : > { %v708_v56 = vpop.eup %707  ;;  %v527_v57 = vmul.f32 1.0614054, %v706_v53 }
 0x342   : > { %v528_v58 = vmul.f32 1.0614054, %v708_v56  ;;  %v529_v59 = vadd.f32 -1.4531521, %v526_v54  ;;  %v710_v13 = vpop.eup %709 }
 0x343   : > { %v530_v40 = vadd.f32 -1.4531521, %v527_v57  ;;  %v712_v15 = vpop.eup %711 }
 0x344   : > { %v531_v60 = vadd.f32 -1.4531521, %v528_v58  ;;  %v532_v41 = vmul.f32 %v704_v52, %v529_v59  ;;  %v714_v18 = vpop.eup %713 }
 0x345   : > { %v533_v45 = vmul.f32 %v706_v53, %v530_v40 }
 0x346   : > { %v534_v42 = vmul.f32 %v708_v56, %v531_v60  ;;  %v535_v61 = vadd.f32 1.4214138, %v532_v41 }
 0x347   : > { %v536_v62 = vadd.f32 1.4214138, %v533_v45 }
 0x348   : > { %v537_v63 = vadd.f32 1.4214138, %v534_v42  ;;  %v538_v0 = vmul.f32 %v704_v52, %v535_v61 }
 0x349   : > { %v539_v1 = vmul.f32 %v706_v53, %v536_v62 }
 0x34a   : > { %v540_v2 = vmul.f32 %v708_v56, %v537_v63  ;;  %v541_v3 = vadd.f32 -0.28449672, %v538_v0 }
 0x34b   : > { %v542_v4 = vadd.f32 -0.28449672, %v539_v1 }
 0x34c   : > { %v543_v5 = vadd.f32 -0.28449672, %v540_v2  ;;  %v544_v6 = vmul.f32 %v704_v52, %v541_v3 }
 0x34d   : > { %v545_v7 = vmul.f32 %v706_v53, %v542_v4 }
 0x34e   : > { %v546_v8 = vmul.f32 %v708_v56, %v543_v5  ;;  %v547_v9 = vadd.f32 0.2548296, %v544_v6 }
 0x34f   : > { %v548_v10 = vadd.f32 0.2548296, %v545_v7 }
 0x350   : > { %v549_v11 = vadd.f32 0.2548296, %v546_v8  ;;  %v550_v12 = vmul.f32 %v704_v52, %v547_v9 }
 0x351   : > { %v551_v14 = vmul.f32 %v706_v53, %v548_v10 }
 0x352   : > { %v552_v16 = vmul.f32 %v708_v56, %v549_v11  ;;  %v565_v17 = vmul.f32 %v710_v13, %v550_v12 }
 0x353   : > { %v566_v19 = vmul.f32 %v712_v15, %v551_v14 }
 0x354   : > { %v567_v20 = vmul.f32 %v714_v18, %v552_v16  ;;  %v568_v21 = vsub.f32 1.0, %v565_v17 }
 0x355   : > { %v569_v22 = vsub.f32 1.0, %v566_v19 }
 0x356   : > { %v570_v23 = vsub.f32 1.0, %v567_v20  ;;  %v574_v24 = vsub.f32 0.0, %v568_v21 }
 0x357   : > { %v575_v31 = vsub.f32 0.0, %v569_v22 }
 0x358   : > { %v576_v32 = vsub.f32 0.0, %v570_v23  ;;  %v577_v33 = vsel %vm571_vm7, %v574_v24, %v568_v21 }
 0x359   : > { %v578_v35 = vsel %vm572_vm8, %v575_v31, %v569_v22  ;;  %v580_v36 = vadd.f32 1.0, %v577_v33 }
 0x35a   : > { %v579_v38 = vsel %vm573_vm9, %v576_v32, %v570_v23  ;;  %v581_v28 = vadd.f32 1.0, %v578_v35 }
 0x35b   : > { %v582_v29 = vadd.f32 1.0, %v579_v38  ;;  %v583_v46 = vmul.f32 %v580_v36, %v505_v34 }
 0x35c   : > { %v584_v47 = vmul.f32 %v581_v28, %v506_v37 }
 0x35d   : > { %v585_v48 = vmul.f32 %v582_v29, %v507_v39  ;;  %586 = vst [vmem:[%s170_s24] sm:$0xff] %v583_v46 }
 0x35e   : > { %587 = vst [vmem:[%s170_s24 + $0x8] sm:$0xff] %v584_v47 }
 0x35f   : > { %588 = vst.msk [vmem:[%s170_s24 + $0x10] sm:$0xff] %vm275_vm3, %v585_v48 }
 0x360 PF: > { %s13_s12 = sadd.s32 1, %s721_s12  }
 0x361   : > { %p10_p4 = scmp.ge.s32.totalorder %s13_s12, 4  }
 0x363   :  { %12 = sbr.rel (!%p10_p4) target bundleno = 1 (0x1), region = 62 }

// kernel: reverse.1
= control target key start
LH: loop header
LB: loop body
LE: loop exit
PB: predicated region body
PF: predicated region fallthrough
CT: control target
= control target key end

     0   :  { %s584_s0 = inlined_call_operand.vmem [shape: f32[2,8,8,8,3], index: 0, kind: input, shape index: {}]   ;;  %s585_s1 = inlined_call_operand.vmem [shape: f32[2,8,8,8,3], index: 1, kind: output, shape index: {}]  }
   0x1   :  { %v192_v0 = vld [vmem:[%s584_s0 + $0x10] sm:$0xff]  ;;  %v195_v2 = vld [vmem:[%s584_s0 + $0x28] sm:$0xff]  ;;  %v199_v4 = vld [vmem:[%s584_s0 + $0x40] sm:$0xff] }
   0x2   :  { %v193_v1 = vld [vmem:[%s584_s0 + $0xd0] sm:$0xff]  ;;  %4 = vst [vmem:[%s585_s1] sm:$0xff] %v192_v0  ;;  %196 = vst [vmem:[%s585_s1 + $0x18] sm:$0xff] %v195_v2  ;;  %v197_v3 = vld [vmem:[%s584_s0 + $0xe8] sm:$0xff] }
   0x3   :  { %194 = vst [vmem:[%s585_s1 + $0xc0] sm:$0xff] %v193_v1  ;;  %v201_v5 = vld [vmem:[%s584_s0 + $0x100] sm:$0xff]  ;;  %198 = vst [vmem:[%s585_s1 + $0xd8] sm:$0xff] %v197_v3  ;;  %v203_v6 = vld [vmem:[%s584_s0 + $0x58] sm:$0xff] }
   0x4   :  { %200 = vst [vmem:[%s585_s1 + $0x30] sm:$0xff] %v199_v4  ;;  %202 = vst [vmem:[%s585_s1 + $0xf0] sm:$0xff] %v201_v5  ;;  %v205_v7 = vld [vmem:[%s584_s0 + $0x118] sm:$0xff]  ;;  %v207_v8 = vld [vmem:[%s584_s0 + $0x70] sm:$0xff] }
   0x5   :  { %204 = vst [vmem:[%s585_s1 + $0x48] sm:$0xff] %v203_v6  ;;  %206 = vst [vmem:[%s585_s1 + $0x108] sm:$0xff] %v205_v7  ;;  %v209_v9 = vld [vmem:[%s584_s0 + $0x130] sm:$0xff]  ;;  %v211_v10 = vld [vmem:[%s584_s0 + $0x88] sm:$0xff] }
   0x6   :  { %208 = vst [vmem:[%s585_s1 + $0x60] sm:$0xff] %v207_v8  ;;  %v213_v11 = vld [vmem:[%s584_s0 + $0x148] sm:$0xff]  ;;  %210 = vst [vmem:[%s585_s1 + $0x120] sm:$0xff] %v209_v9  ;;  %v215_v12 = vld [vmem:[%s584_s0 + $0xa0] sm:$0xff] }
   0x7   :  { %212 = vst [vmem:[%s585_s1 + $0x78] sm:$0xff] %v211_v10  ;;  %214 = vst [vmem:[%s585_s1 + $0x138] sm:$0xff] %v213_v11  ;;  %v217_v13 = vld [vmem:[%s584_s0 + $0x160] sm:$0xff]  ;;  %v219_v14 = vld [vmem:[%s584_s0 + $0xb8] sm:$0xff] }
   0x8   :  { %216 = vst [vmem:[%s585_s1 + $0x90] sm:$0xff] %v215_v12  ;;  %218 = vst [vmem:[%s585_s1 + $0x150] sm:$0xff] %v217_v13  ;;  %v221_v15 = vld [vmem:[%s584_s0 + $0x178] sm:$0xff]  ;;  %v223_v16 = vld [vmem:[%s584_s0 + $0x8] sm:$0xff] }
   0x9   :  { %220 = vst [vmem:[%s585_s1 + $0xa8] sm:$0xff] %v219_v14  ;;  %v225_v17 = vld [vmem:[%s584_s0 + $0xc8] sm:$0xff]  ;;  %222 = vst [vmem:[%s585_s1 + $0x168] sm:$0xff] %v221_v15  ;;  %v227_v18 = vld [vmem:[%s584_s0 + $0x20] sm:$0xff] }
   0xa   :  { %224 = vst [vmem:[%s585_s1 + $0x8] sm:$0xff] %v223_v16  ;;  %226 = vst [vmem:[%s585_s1 + $0xc8] sm:$0xff] %v225_v17  ;;  %v229_v19 = vld [vmem:[%s584_s0 + $0xe0] sm:$0xff]  ;;  %v231_v20 = vld [vmem:[%s584_s0 + $0x38] sm:$0xff] }
   0xb   :  { %228 = vst [vmem:[%s585_s1 + $0x20] sm:$0xff] %v227_v18  ;;  %230 = vst [vmem:[%s585_s1 + $0xe0] sm:$0xff] %v229_v19  ;;  %v233_v21 = vld [vmem:[%s584_s0 + $0xf8] sm:$0xff]  ;;  %v235_v22 = vld [vmem:[%s584_s0 + $0x50] sm:$0xff] }
   0xc   :  { %232 = vst [vmem:[%s585_s1 + $0x38] sm:$0xff] %v231_v20  ;;  %v237_v23 = vld [vmem:[%s584_s0 + $0x110] sm:$0xff]  ;;  %234 = vst [vmem:[%s585_s1 + $0xf8] sm:$0xff] %v233_v21  ;;  %v239_v24 = vld [vmem:[%s584_s0 + $0x68] sm:$0xff] }
   0xd   :  { %236 = vst [vmem:[%s585_s1 + $0x50] sm:$0xff] %v235_v22  ;;  %238 = vst [vmem:[%s585_s1 + $0x110] sm:$0xff] %v237_v23  ;;  %v241_v25 = vld [vmem:[%s584_s0 + $0x128] sm:$0xff]  ;;  %v243_v26 = vld [vmem:[%s584_s0 + $0x80] sm:$0xff] }
   0xe   :  { %240 = vst [vmem:[%s585_s1 + $0x68] sm:$0xff] %v239_v24  ;;  %242 = vst [vmem:[%s585_s1 + $0x128] sm:$0xff] %v241_v25  ;;  %v245_v27 = vld [vmem:[%s584_s0 + $0x140] sm:$0xff]  ;;  %v247_v28 = vld [vmem:[%s584_s0 + $0x98] sm:$0xff] }
   0xf   :  { %244 = vst [vmem:[%s585_s1 + $0x80] sm:$0xff] %v243_v26  ;;  %v249_v29 = vld [vmem:[%s584_s0 + $0x158] sm:$0xff]  ;;  %246 = vst [vmem:[%s585_s1 + $0x140] sm:$0xff] %v245_v27  ;;  %v251_v30 = vld [vmem:[%s584_s0 + $0xb0] sm:$0xff] }
  0x10   :  { %248 = vst [vmem:[%s585_s1 + $0x98] sm:$0xff] %v247_v28  ;;  %250 = vst [vmem:[%s585_s1 + $0x158] sm:$0xff] %v249_v29  ;;  %v253_v31 = vld [vmem:[%s584_s0 + $0x170] sm:$0xff]  ;;  %v129_v32 = vld [vmem:[%s584_s0] sm:$0xff] }
  0x11   :  { %252 = vst [vmem:[%s585_s1 + $0xb0] sm:$0xff] %v251_v30  ;;  %254 = vst [vmem:[%s585_s1 + $0x170] sm:$0xff] %v253_v31  ;;  %v256_v33 = vld [vmem:[%s584_s0 + $0xc0] sm:$0xff]  ;;  %v258_v34 = vld [vmem:[%s584_s0 + $0x18] sm:$0xff] }
  0x12   :  { %255 = vst [vmem:[%s585_s1 + $0x10] sm:$0xff] %v129_v32  ;;  %v260_v35 = vld [vmem:[%s584_s0 + $0xd8] sm:$0xff]  ;;  %257 = vst [vmem:[%s585_s1 + $0xd0] sm:$0xff] %v256_v33  ;;  %v262_v36 = vld [vmem:[%s584_s0 + $0x30] sm:$0xff] }
  0x13   :  { %259 = vst [vmem:[%s585_s1 + $0x28] sm:$0xff] %v258_v34  ;;  %261 = vst [vmem:[%s585_s1 + $0xe8] sm:$0xff] %v260_v35  ;;  %v264_v37 = vld [vmem:[%s584_s0 + $0xf0] sm:$0xff]  ;;  %v266_v38 = vld [vmem:[%s584_s0 + $0x48] sm:$0xff] }
  0x14   :  { %263 = vst [vmem:[%s585_s1 + $0x40] sm:$0xff] %v262_v36  ;;  %265 = vst [vmem:[%s585_s1 + $0x100] sm:$0xff] %v264_v37  ;;  %v268_v39 = vld [vmem:[%s584_s0 + $0x108] sm:$0xff]  ;;  %v270_v40 = vld [vmem:[%s584_s0 + $0x60] sm:$0xff] }
  0x15   :  { %267 = vst [vmem:[%s585_s1 + $0x58] sm:$0xff] %v266_v38  ;;  %v272_v41 = vld [vmem:[%s584_s0 + $0x120] sm:$0xff]  ;;  %269 = vst [vmem:[%s585_s1 + $0x118] sm:$0xff] %v268_v39  ;;  %v274_v42 = vld [vmem:[%s584_s0 + $0x78] sm:$0xff] }
  0x16   :  { %271 = vst [vmem:[%s585_s1 + $0x70] sm:$0xff] %v270_v40  ;;  %273 = vst [vmem:[%s585_s1 + $0x130] sm:$0xff] %v272_v41  ;;  %v276_v43 = vld [vmem:[%s584_s0 + $0x138] sm:$0xff]  ;;  %v278_v44 = vld [vmem:[%s584_s0 + $0x90] sm:$0xff] }
  0x17   :  { %275 = vst [vmem:[%s585_s1 + $0x88] sm:$0xff] %v274_v42  ;;  %277 = vst [vmem:[%s585_s1 + $0x148] sm:$0xff] %v276_v43  ;;  %v280_v45 = vld [vmem:[%s584_s0 + $0x150] sm:$0xff]  ;;  %v282_v46 = vld [vmem:[%s584_s0 + $0xa8] sm:$0xff] }
  0x18   :  { %279 = vst [vmem:[%s585_s1 + $0xa0] sm:$0xff] %v278_v44  ;;  %v284_v47 = vld [vmem:[%s584_s0 + $0x168] sm:$0xff]  ;;  %281 = vst [vmem:[%s585_s1 + $0x160] sm:$0xff] %v280_v45 }
  0x19   :  { %283 = vst [vmem:[%s585_s1 + $0xb8] sm:$0xff] %v282_v46  ;;  %285 = vst [vmem:[%s585_s1 + $0x178] sm:$0xff] %v284_v47 }

// kernel: down_block_forward.11
= control target key start
LH: loop header
LB: loop body
LE: loop exit
PB: predicated region body
PF: predicated region fallthrough
CT: control target
= control target key end

     0   :  { %s369_s12 = smov 0   ;;  %s392_s0 = inlined_call_operand.vmem [shape: f32[2,8,512], index: 0, kind: input, shape index: {}]   ;;  %s393_s1 = inlined_call_operand.vmem [shape: f32[2,8,512], index: 1, kind: input, shape index: {}]   ;;  %s394_s2 = inlined_call_operand.vmem [shape: f32[2,8,512], index: 2, kind: input, shape index: {}]   ;;  %s395_s3 = inlined_call_operand.vmem [shape: f32[2,8,512], index: 3, kind: output, shape index: {}]  }
   0x1 LB: > { %s314_s13 = sadd.s32 4294967295, %s347_s12   ;;  %p318_p0 = scmp.ge.s32.totalorder %s347_s12, 1  ;;  %s347_s12 = sphi %s369_s12, %s13_s12  }
   0x2   : > { %p157_p1 = scmp.lt.s32.totalorder %s347_s12, 3 }
   0x4   : > { %p158_p2 = pnand %p318_p0, %p157_p1 }
   0x5   : > { %p191_p3 = scmp.lt.s32.totalorder (!%p158_p2), %s314_s13, 1 }
   0x6   : > { %161 = sbr.rel (%p158_p2) target bundleno = 24 (0x18), region = 32 }
   0xb   : > { %s397_s13 = smov (!%p191_p3, %s314_s13), 1 }
   0xc   : > { %s329_s14 = sshll.u32 %s397_s13, 5 }
   0xd   : > { %s195_s17 = scalar_lea.vmem %s392_s0, %s329_s14  ;;  %s200_s20 = scalar_lea.vmem %s393_s1, %s329_s14 }
   0xe   : > { %s205_s23 = scalar_lea.vmem %s394_s2, %s329_s14  ;;  %v211_v0 = vld [vmem:[%s195_s17] sm:$0xff]  ;;  %v212_v2 = vld [vmem:[%s195_s17 + $0x8] sm:$0xff]  ;;  %s210_s26 = scalar_lea.vmem %s395_s3, %s329_s14  ;;  %v213_v8 = vld [vmem:[%s195_s17 + $0x10] sm:$0xff] }
   0xf   : > { %v215_v1 = vld [vmem:[%s200_s20] sm:$0xff]  ;;  %v216_v5 = vld [vmem:[%s200_s20 + $0x8] sm:$0xff]  ;;  %v217_v9 = vld [vmem:[%s200_s20 + $0x10] sm:$0xff] }
  0x10   : > { %v219_v3 = vadd.f32 %v215_v1, %v211_v0  ;;  %v223_v4 = vld [vmem:[%s205_s23] sm:$0xff]  ;;  %v224_v6 = vld [vmem:[%s205_s23 + $0x8] sm:$0xff]  ;;  %v220_v7 = vadd.f32 %v216_v5, %v212_v2  ;;  %v225_v10 = vld [vmem:[%s205_s23 + $0x10] sm:$0xff]  ;;  %v221_v12 = vadd.f32 %v217_v9, %v213_v8 }
  0x11   : > { %v214_v13 = vld [vmem:[%s195_s17 + $0x18] sm:$0xff] }
  0x12   : > { %v227_v11 = vadd.f32 %v223_v4, %v219_v3  ;;  %v218_v14 = vld [vmem:[%s200_s20 + $0x18] sm:$0xff]  ;;  %v228_v16 = vadd.f32 %v224_v6, %v220_v7  ;;  %v229_v18 = vadd.f32 %v225_v10, %v221_v12 }
  0x13   : > { %v226_v15 = vld [vmem:[%s205_s23 + $0x18] sm:$0xff]  ;;  %v222_v17 = vadd.f32 %v218_v14, %v214_v13 }
  0x14   : > { %231 = vst [vmem:[%s210_s26] sm:$0xff] %v227_v11  ;;  %232 = vst [vmem:[%s210_s26 + $0x8] sm:$0xff] %v228_v16 }
  0x15   : > { %v230_v19 = vadd.f32 %v226_v15, %v222_v17  ;;  %233 = vst [vmem:[%s210_s26 + $0x10] sm:$0xff] %v229_v18 }
  0x17   : > { %234 = vst [vmem:[%s210_s26 + $0x18] sm:$0xff] %v230_v19 }
  0x18 PF: > { %s13_s12 = sadd.s32 1, %s347_s12  }
  0x19   : > { %p10_p4 = scmp.ge.s32.totalorder %s13_s12, 4  }
  0x1b   :  { %12 = sbr.rel (!%p10_p4) target bundleno = 1 (0x1), region = 68 }

</bundles_post_ra>
